<compile_context>
chip_gen: v6e
topology: v6e:2x2x1
jax: 0.10.0
libtpu: 0.0.40
codegen_flags: <defaults>
</compile_context>

<pallas_src>
import functools

import jax
import jax.numpy as jnp
from jax.experimental import pallas as pl
from jax.experimental.pallas import tpu as pltpu


N_CNN_P = 18   # number of parameter arrays per CNN block


def _dot(a, b):
    return jnp.dot(a, b, preferred_element_type=jnp.float32)


def _next_row(x):
    # row i -> value of row i+1 (wraps at the end; wrapped rows are masked/discarded by callers)
    return pltpu.roll(x, shift=x.shape[0] - 1, axis=0)


def _prev_row(x):
    # row i -> value of row i-1 (wraps at the start; wrapped rows are masked by callers)
    return pltpu.roll(x, shift=1, axis=0)


def _tree_sum(parts):
    # balanced reduction so the small dots are independent (no serial accumulation chain)
    while len(parts) > 1:
        nxt = [parts[i] + parts[i + 1] for i in range(0, len(parts) - 1, 2)]
        if len(parts) % 2:
            nxt.append(parts[-1])
        parts = nxt
    return parts[0]


# -----------------------------------------------------------------------------
# One CNN block (Conv+BN+ReLU+Pool) x2 + flatten + 3x(Linear+Tanh), whole batch at once.
# All position/channel tensors are 2-D (rows = batch*position, lanes = channels).
# -----------------------------------------------------------------------------
def _cnn_block(xt_ref, p_refs, B, L):
    (w1, b1, s1, t1, w2, b2, s2, t2,
     e1, e2, ml, mr, wl1, bl1, wl2, bl2, wl3, bl3) = p_refs
    L2, L4 = L // 2, L // 4

    # Conv2d(1, mid, (1,3), pad=1) as one im2col matmul over all B*L rows,
    # then eval-mode BatchNorm folded into scale/shift, then ReLU.
    c1 = _dot(xt_ref[...], w1[...]) + b1[...]                        # (B*L, mid)
    r1 = jnp.maximum(c1 * s1[...] + t1[...], 0.0)
    pad1 = jnp.maximum(b1[...] * s1[...] + t1[...], 0.0)             # H-pad rows: relu(bn(bias))

    # MaxPool2d(2,2): pair max on the VPU (sublane roll), stride-2 compaction with a
    # single 0/1 selector matmul, then max with the H-pad row value.
    m1 = jnp.maximum(r1, _next_row(r1))
    p1 = jnp.maximum(_dot(e1[...], m1), pad1)                        # (B*L2, mid), row = b*L2 + j

    # Conv2d(mid, out, (1,3), pad=1): +-1 position taps via sublane roll + boundary masks
    # (masks zero the taps that would cross a batch/sequence boundary).
    left = _prev_row(p1) * ml[...]
    right = _next_row(p1) * mr[...]
    c2 = (_dot(left, w2[0]) + _dot(p1, w2[1]) + _dot(right, w2[2])) + b2[...]   # (B*L2, nout)
    r2 = jnp.maximum(c2 * s2[...] + t2[...], 0.0)
    pad2 = jnp.maximum(b2[...] * s2[...] + t2[...], 0.0)

    # Second MaxPool; the compaction selector also permutes rows to (w*B + b) order so the
    # NCHW flatten below only needs contiguous static slices.
    m2 = jnp.maximum(r2, _next_row(r2))
    p2 = jnp.maximum(_dot(e2[...], m2), pad2)                        # (L4*B, nout), row = w*B + b

    # Flatten (PyTorch NCHW order folded into wl1) + Linear/Tanh stack.
    parts = [_dot(p2[w * B:(w + 1) * B, :], wl1[w]) for w in range(L4)]   # each (B, mid)
    y = jnp.tanh(_tree_sum(parts) + bl1[...])
    y = jnp.tanh(_dot(y, wl2[...]) + bl2[...])
    y = jnp.tanh(_dot(y, wl3[...]) + bl3[...])
    return y                                                          # (B, nout)


# -----------------------------------------------------------------------------
# Fused Encoder kernel: both CNNs + self.dense + self.attn_dense in one invocation.
# -----------------------------------------------------------------------------
def encoder_kernel(*refs):
    ls_ref, ll_ref, xts_ref, xtl_ref = refs[:4]
    seq_p = refs[4:4 + N_CNN_P]
    ser_p = refs[4 + N_CNN_P:4 + 2 * N_CNN_P]
    wd_ref, bd_ref, wa_ref, ba_ref = refs[4 + 2 * N_CNN_P:4 + 2 * N_CNN_P + 4]
    hid_ref, attn_ref = refs[-2], refs[-1]

    B, seq_len = ls_ref.shape
    ser_len = ll_ref.shape[1]
    out_sz = ser_p[5].shape[1]            # b2 of the series CNN: (1, output_size)

    h_short = _cnn_block(xts_ref, seq_p, B, seq_len)    # (B, out)
    h_long = _cnn_block(xtl_ref, ser_p, B, ser_len)     # (B, out)

    # enc_hidden = cat(l_short, l_long, h_short, h_long) @ Wd + bd, computed with the
    # weight split into its row blocks (mathematically identical, no in-kernel concat).
    wd = wd_ref[...]
    o1 = seq_len
    o2 = seq_len + ser_len
    o3 = seq_len + ser_len + out_sz
    hid_ref[...] = (_dot(ls_ref[...], wd[:o1, :])
                    + _dot(ll_ref[...], wd[o1:o2, :])
                    + _dot(h_short, wd[o2:o3, :])
                    + _dot(h_long, wd[o3:, :])
                    + bd_ref[...])

    # attn_vector = cat(h_short, h_long) @ Wa + ba
    wa = wa_ref[...]
    attn_ref[...] = (_dot(h_short, wa[:out_sz, :])
                     + _dot(h_long, wa[out_sz:, :])
                     + ba_ref[...])
    # TODO(synk): nn.Dropout(p=0.3) path skipped (config use_dropout=False; identity in eval).


# -----------------------------------------------------------------------------
# Host-side glue: im2col of the (already list-padded) 1-D inputs, fused pallas_call.
# -----------------------------------------------------------------------------
def _im2col_1d3(x):
    """(B, L) -> (B*L, 3) taps for Conv2d(kernel=(1,3), padding=1). Pure input layout."""
    B, L = x.shape
    xpad = jnp.pad(x, ((0, 0), (1, 1)))
    taps = jnp.stack([xpad[:, k:k + L] for k in range(3)], axis=-1)    # (B, L, 3)
    return taps.reshape(B * L, 3)


@functools.partial(jax.jit, static_argnames=("mini_batch_size",))
def encoder_forward(l_short, l_long, params, mini_batch_size):
    """Encoder.forward for use_series=True, use_attn=True, enc_type != 'summ'.

    l_short / l_long are the already zero-padded seq / series values (B, seq_len),
    (B, series_len) — the ragged-list padding in the PyTorch forward is host-side glue.
    """
    B, seq_len = l_short.shape
    ser_len = l_long.shape[1]
    assert seq_len % 4 == 0 and ser_len % 4 == 0, "CNN flatten assumes L % 4 == 0"
    hid = params["w_dense"].shape[1]

    ins = ([l_short, l_long, _im2col_1d3(l_short), _im2col_1d3(l_long)]
           + list(params["seq"]) + list(params["series"])
           + [params["w_dense"], params["b_dense"], params["w_attn"], params["b_attn"]])

    enc_hidden, attn = pl.pallas_call(
        encoder_kernel,
        out_shape=(jax.ShapeDtypeStruct((B, hid), jnp.float32),
                   jax.ShapeDtypeStruct((B, hid), jnp.float32)),
    )(*ins)
    return enc_hidden, attn.reshape(mini_batch_size, 1, -1)


# -----------------------------------------------------------------------------
# Parameter construction (deterministic synthetic init; PyTorch-shaped tensors are
# reshaped/permuted for the kernel layout and BN(eval) is folded — pure glue).
# -----------------------------------------------------------------------------
def make_cnn_params(key, L, mid, nout, B):
    assert L % 4 == 0
    L2, L4 = L // 2, L // 4
    lin_in = L4 * nout                          # == int(L/4) * output_size
    ks = jax.random.split(key, 18)
    f32 = jnp.float32

    conv1_w = 0.3 * jax.random.normal(ks[0], (mid, 1, 1, 3), f32)     # Conv2d(1, mid, (1,3))
    conv1_b = 0.1 * jax.random.normal(ks[1], (mid,), f32)
    bn1_g = 1.0 + 0.1 * jax.random.normal(ks[2], (mid,), f32)
    bn1_b = 0.1 * jax.random.normal(ks[3], (mid,), f32)
    bn1_m = 0.1 * jax.random.normal(ks[4], (mid,), f32)
    bn1_v = 0.5 + jax.random.uniform(ks[5], (mid,), f32)
    conv2_w = jax.random.normal(ks[6], (nout, mid, 1, 3), f32) / jnp.sqrt(3.0 * mid)
    conv2_b = 0.1 * jax.random.normal(ks[7], (nout,), f32)
    bn2_g = 1.0 + 0.1 * jax.random.normal(ks[8], (nout,), f32)
    bn2_b = 0.1 * jax.random.normal(ks[9], (nout,), f32)
    bn2_m = 0.1 * jax.random.normal(ks[10], (nout,), f32)
    bn2_v = 0.5 + jax.random.uniform(ks[11], (nout,), f32)
    lin1_w = jax.random.normal(ks[12], (mid, lin_in), f32) / jnp.sqrt(1.0 * lin_in)
    lin1_b = 0.1 * jax.random.normal(ks[13], (mid,), f32)
    lin2_w = jax.random.normal(ks[14], (mid, mid), f32) / jnp.sqrt(1.0 * mid)
    lin2_b = 0.1 * jax.random.normal(ks[15], (mid,), f32)
    lin3_w = jax.random.normal(ks[16], (nout, mid), f32) / jnp.sqrt(1.0 * mid)
    lin3_b = 0.1 * jax.random.normal(ks[17], (nout,), f32)

    eps = 1e-5  # eval-mode BatchNorm folded into per-channel scale/shift
    s1 = bn1_g / jnp.sqrt(bn1_v + eps); t1 = bn1_b - bn1_m * s1
    s2 = bn2_g / jnp.sqrt(bn2_v + eps); t2 = bn2_b - bn2_m * s2

    w1 = jnp.transpose(conv1_w.reshape(mid, 3), (1, 0))               # (3, mid)
    w2 = jnp.transpose(conv2_w.reshape(nout, mid, 3), (2, 1, 0))      # (3, mid, nout)
    wl1 = jnp.transpose(lin1_w.reshape(mid, nout, L4), (2, 1, 0))     # (L4, nout, mid): NCHW flatten order
    wl2 = lin2_w.T                                                    # (mid, mid)
    wl3 = lin3_w.T                                                    # (mid, nout)

    # Pool-1 compaction: output row b*L2 + j selects input row b*L + 2j.
    r = jnp.arange(B * L2); bb = r // L2; jj = r % L2
    e1 = (jnp.arange(B * L)[None, :] == (bb * L + 2 * jj)[:, None]).astype(f32)     # (B*L2, B*L)
    # Pool-2 compaction + permutation: output row w*B + b selects input row b*L2 + 2w.
    r = jnp.arange(L4 * B); ww = r // B; bb = r % B
    e2 = (jnp.arange(B * L2)[None, :] == (bb * L2 + 2 * ww)[:, None]).astype(f32)   # (L4*B, B*L2)
    # Boundary masks for the +-1 conv2 taps (zero the tap that crossed a sequence edge).
    jj = jnp.arange(B * L2) % L2
    ml = (jj != 0).astype(f32).reshape(-1, 1)          # (B*L2, 1)
    mr = (jj != L2 - 1).astype(f32).reshape(-1, 1)     # (B*L2, 1)

    row = lambda v: v.reshape(1, -1)
    return [w1, row(conv1_b), row(s1), row(t1),
            w2, row(conv2_b), row(s2), row(t2),
            e1, e2, ml, mr,
            wl1, row(lin1_b), wl2, row(lin2_b), wl3, row(lin3_b)]


if __name__ == "__main__":
    key = jax.random.PRNGKey(0)
    B = 2
    SEQ_LEN = 16          # config['seq_length']
    SERIES_LEN = 32       # config['max_series_size']
    HID = 32              # config['enc_hidden_size']
    OUT = 16              # config['enc_output_size']
    CAT_HIDDEN = SERIES_LEN + SEQ_LEN + 2 * OUT   # use_series=True -> multiple=2

    k_in1, k_in2, k_seq, k_ser, k_dense = jax.random.split(key, 5)
    l_short = jax.random.normal(k_in1, (B, SEQ_LEN), jnp.float32)
    l_long = jax.random.normal(k_in2, (B, SERIES_LEN), jnp.float32)

    kd1, kd2, kd3, kd4 = jax.random.split(k_dense, 4)
    params = {
        "seq": make_cnn_params(k_seq, SEQ_LEN, HID, OUT, B),
        "series": make_cnn_params(k_ser, SERIES_LEN, HID, OUT, B),
        # nn.Linear(cat_hidden, hid):  y = x @ W.T + b  (we pass W.T)
        "w_dense": (jax.random.normal(kd1, (HID, CAT_HIDDEN), jnp.float32)
                    / jnp.sqrt(1.0 * CAT_HIDDEN)).T,
        "b_dense": (0.1 * jax.random.normal(kd2, (HID,), jnp.float32)).reshape(1, -1),
        # nn.Linear(output_size * 2, hid)
        "w_attn": (jax.random.normal(kd3, (HID, 2 * OUT), jnp.float32)
                   / jnp.sqrt(2.0 * OUT)).T,
        "b_attn": (0.1 * jax.random.normal(kd4, (HID,), jnp.float32)).reshape(1, -1),
    }

    enc_hidden, attn_vector = encoder_forward(l_short, l_long, params, mini_batch_size=B)
    jax.block_until_ready((enc_hidden, attn_vector))

    assert enc_hidden.shape == (B, HID) and enc_hidden.dtype == jnp.float32
    assert attn_vector.shape == (B, 1, HID) and attn_vector.dtype == jnp.float32
    print("KERNEL_OK")
</pallas_src>

<mosaic_0001>
module attributes {stable_mosaic.version = 11 : i64} {
  func.func @encoder_kernel(%arg0: memref<2x16xf32, #tpu.memory_space<vmem>>, %arg1: memref<2x32xf32, #tpu.memory_space<vmem>>, %arg2: memref<32x3xf32, #tpu.memory_space<vmem>>, %arg3: memref<64x3xf32, #tpu.memory_space<vmem>>, %arg4: memref<3x32xf32, #tpu.memory_space<vmem>>, %arg5: memref<1x32xf32, #tpu.memory_space<vmem>>, %arg6: memref<1x32xf32, #tpu.memory_space<vmem>>, %arg7: memref<1x32xf32, #tpu.memory_space<vmem>>, %arg8: memref<3x32x16xf32, #tpu.memory_space<vmem>>, %arg9: memref<1x16xf32, #tpu.memory_space<vmem>>, %arg10: memref<1x16xf32, #tpu.memory_space<vmem>>, %arg11: memref<1x16xf32, #tpu.memory_space<vmem>>, %arg12: memref<16x32xf32, #tpu.memory_space<vmem>>, %arg13: memref<8x16xf32, #tpu.memory_space<vmem>>, %arg14: memref<16x1xf32, #tpu.memory_space<vmem>>, %arg15: memref<16x1xf32, #tpu.memory_space<vmem>>, %arg16: memref<4x16x32xf32, #tpu.memory_space<vmem>>, %arg17: memref<1x32xf32, #tpu.memory_space<vmem>>, %arg18: memref<32x32xf32, #tpu.memory_space<vmem>>, %arg19: memref<1x32xf32, #tpu.memory_space<vmem>>, %arg20: memref<32x16xf32, #tpu.memory_space<vmem>>, %arg21: memref<1x16xf32, #tpu.memory_space<vmem>>, %arg22: memref<3x32xf32, #tpu.memory_space<vmem>>, %arg23: memref<1x32xf32, #tpu.memory_space<vmem>>, %arg24: memref<1x32xf32, #tpu.memory_space<vmem>>, %arg25: memref<1x32xf32, #tpu.memory_space<vmem>>, %arg26: memref<3x32x16xf32, #tpu.memory_space<vmem>>, %arg27: memref<1x16xf32, #tpu.memory_space<vmem>>, %arg28: memref<1x16xf32, #tpu.memory_space<vmem>>, %arg29: memref<1x16xf32, #tpu.memory_space<vmem>>, %arg30: memref<32x64xf32, #tpu.memory_space<vmem>>, %arg31: memref<16x32xf32, #tpu.memory_space<vmem>>, %arg32: memref<32x1xf32, #tpu.memory_space<vmem>>, %arg33: memref<32x1xf32, #tpu.memory_space<vmem>>, %arg34: memref<8x16x32xf32, #tpu.memory_space<vmem>>, %arg35: memref<1x32xf32, #tpu.memory_space<vmem>>, %arg36: memref<32x32xf32, #tpu.memory_space<vmem>>, %arg37: memref<1x32xf32, #tpu.memory_space<vmem>>, %arg38: memref<32x16xf32, #tpu.memory_space<vmem>>, %arg39: memref<1x16xf32, #tpu.memory_space<vmem>>, %arg40: memref<80x32xf32, #tpu.memory_space<vmem>>, %arg41: memref<1x32xf32, #tpu.memory_space<vmem>>, %arg42: memref<32x32xf32, #tpu.memory_space<vmem>>, %arg43: memref<1x32xf32, #tpu.memory_space<vmem>>, %arg44: memref<2x32xf32, #tpu.memory_space<vmem>>, %arg45: memref<2x32xf32, #tpu.memory_space<vmem>>) attributes {dimension_semantics = [], scalar_prefetch = 0 : i64, scratch_operands = 0 : i64, tpu.core_type = #tpu.core_type<tc>} {
    %c0 = arith.constant 0 : index
    %c0_0 = arith.constant 0 : index
    %0 = vector.load %arg2[%c0, %c0_0] : memref<32x3xf32, #tpu.memory_space<vmem>>, vector<32x3xf32>
    %c0_1 = arith.constant 0 : index
    %c0_2 = arith.constant 0 : index
    %1 = vector.load %arg4[%c0_1, %c0_2] : memref<3x32xf32, #tpu.memory_space<vmem>>, vector<3x32xf32>
    %cst = arith.constant dense<0.000000e+00> : vector<32x32xf32>
    %2 = tpu.matmul %0, %1, %cst {dimension_numbers = #tpu.dot_dimension_numbers<[1], [0], [0], [1], [0, 0, 1, 1], [], []>} : vector<32x3xf32>, vector<3x32xf32>, vector<32x32xf32> -> vector<32x32xf32>
    %c0_3 = arith.constant 0 : index
    %c0_4 = arith.constant 0 : index
    %3 = vector.load %arg5[%c0_3, %c0_4] : memref<1x32xf32, #tpu.memory_space<vmem>>, vector<1x32xf32>
    %4 = vector.broadcast %3 : vector<1x32xf32> to vector<32x32xf32>
    %5 = arith.addf %2, %4 : vector<32x32xf32>
    %c0_5 = arith.constant 0 : index
    %c0_6 = arith.constant 0 : index
    %6 = vector.load %arg6[%c0_5, %c0_6] : memref<1x32xf32, #tpu.memory_space<vmem>>, vector<1x32xf32>
    %7 = vector.broadcast %6 : vector<1x32xf32> to vector<32x32xf32>
    %8 = arith.mulf %5, %7 : vector<32x32xf32>
    %c0_7 = arith.constant 0 : index
    %c0_8 = arith.constant 0 : index
    %9 = vector.load %arg7[%c0_7, %c0_8] : memref<1x32xf32, #tpu.memory_space<vmem>>, vector<1x32xf32>
    %10 = vector.broadcast %9 : vector<1x32xf32> to vector<32x32xf32>
    %11 = arith.addf %8, %10 : vector<32x32xf32>
    %cst_9 = arith.constant 0.000000e+00 : f32
    %12 = vector.broadcast %cst_9 : f32 to vector<32x32xf32>
    %13 = arith.maximumf %11, %12 : vector<32x32xf32>
    %c0_10 = arith.constant 0 : index
    %c0_11 = arith.constant 0 : index
    %14 = vector.load %arg5[%c0_10, %c0_11] : memref<1x32xf32, #tpu.memory_space<vmem>>, vector<1x32xf32>
    %c0_12 = arith.constant 0 : index
    %c0_13 = arith.constant 0 : index
    %15 = vector.load %arg6[%c0_12, %c0_13] : memref<1x32xf32, #tpu.memory_space<vmem>>, vector<1x32xf32>
    %16 = arith.mulf %14, %15 : vector<1x32xf32>
    %c0_14 = arith.constant 0 : index
    %c0_15 = arith.constant 0 : index
    %17 = vector.load %arg7[%c0_14, %c0_15] : memref<1x32xf32, #tpu.memory_space<vmem>>, vector<1x32xf32>
    %18 = arith.addf %16, %17 : vector<1x32xf32>
    %cst_16 = arith.constant 0.000000e+00 : f32
    %19 = vector.broadcast %cst_16 : f32 to vector<1x32xf32>
    %20 = arith.maximumf %18, %19 : vector<1x32xf32>
    %c31_i32 = arith.constant 31 : i32
    %21 = tpu.dynamic_rotate %13 by %c31_i32 dim 0 : vector<32x32xf32>, i32 -> vector<32x32xf32>
    %22 = arith.maximumf %13, %21 : vector<32x32xf32>
    %c0_17 = arith.constant 0 : index
    %c0_18 = arith.constant 0 : index
    %23 = vector.load %arg12[%c0_17, %c0_18] : memref<16x32xf32, #tpu.memory_space<vmem>>, vector<16x32xf32>
    %cst_19 = arith.constant dense<0.000000e+00> : vector<16x32xf32>
    %24 = tpu.matmul %23, %22, %cst_19 {dimension_numbers = #tpu.dot_dimension_numbers<[1], [0], [0], [1], [0, 0, 1, 1], [], []>} : vector<16x32xf32>, vector<32x32xf32>, vector<16x32xf32> -> vector<16x32xf32>
    %25 = vector.broadcast %20 : vector<1x32xf32> to vector<16x32xf32>
    %26 = arith.maximumf %24, %25 : vector<16x32xf32>
    %c1_i32 = arith.constant 1 : i32
    %27 = tpu.dynamic_rotate %26 by %c1_i32 dim 0 : vector<16x32xf32>, i32 -> vector<16x32xf32>
    %c0_20 = arith.constant 0 : index
    %c0_21 = arith.constant 0 : index
    %28 = vector.load %arg14[%c0_20, %c0_21] : memref<16x1xf32, #tpu.memory_space<vmem>>, vector<16x1xf32>
    %29 = vector.broadcast %28 : vector<16x1xf32> to vector<16x32xf32>
    %30 = arith.mulf %27, %29 : vector<16x32xf32>
    %c15_i32 = arith.constant 15 : i32
    %31 = tpu.dynamic_rotate %26 by %c15_i32 dim 0 : vector<16x32xf32>, i32 -> vector<16x32xf32>
    %c0_22 = arith.constant 0 : index
    %c0_23 = arith.constant 0 : index
    %32 = vector.load %arg15[%c0_22, %c0_23] : memref<16x1xf32, #tpu.memory_space<vmem>>, vector<16x1xf32>
    %33 = vector.broadcast %32 : vector<16x1xf32> to vector<16x32xf32>
    %34 = arith.mulf %31, %33 : vector<16x32xf32>
    %c0_24 = arith.constant 0 : index
    %c0_25 = arith.constant 0 : index
    %c0_26 = arith.constant 0 : index
    %35 = vector.load %arg8[%c0_24, %c0_25, %c0_26] : memref<3x32x16xf32, #tpu.memory_space<vmem>>, vector<1x32x16xf32>
    %36 = vector.shape_cast %35 : vector<1x32x16xf32> to vector<32x16xf32>
    %cst_27 = arith.constant dense<0.000000e+00> : vector<16x16xf32>
    %37 = tpu.matmul %30, %36, %cst_27 {dimension_numbers = #tpu.dot_dimension_numbers<[1], [0], [0], [1], [0, 0, 1, 1], [], []>} : vector<16x32xf32>, vector<32x16xf32>, vector<16x16xf32> -> vector<16x16xf32>
    %c1 = arith.constant 1 : index
    %c0_28 = arith.constant 0 : index
    %c0_29 = arith.constant 0 : index
    %38 = vector.load %arg8[%c1, %c0_28, %c0_29] : memref<3x32x16xf32, #tpu.memory_space<vmem>>, vector<1x32x16xf32>
    %39 = vector.shape_cast %38 : vector<1x32x16xf32> to vector<32x16xf32>
    %cst_30 = arith.constant dense<0.000000e+00> : vector<16x16xf32>
    %40 = tpu.matmul %26, %39, %cst_30 {dimension_numbers = #tpu.dot_dimension_numbers<[1], [0], [0], [1], [0, 0, 1, 1], [], []>} : vector<16x32xf32>, vector<32x16xf32>, vector<16x16xf32> -> vector<16x16xf32>
    %41 = arith.addf %37, %40 : vector<16x16xf32>
    %c2 = arith.constant 2 : index
    %c0_31 = arith.constant 0 : index
    %c0_32 = arith.constant 0 : index
    %42 = vector.load %arg8[%c2, %c0_31, %c0_32] : memref<3x32x16xf32, #tpu.memory_space<vmem>>, vector<1x32x16xf32>
    %43 = vector.shape_cast %42 : vector<1x32x16xf32> to vector<32x16xf32>
    %cst_33 = arith.constant dense<0.000000e+00> : vector<16x16xf32>
    %44 = tpu.matmul %34, %43, %cst_33 {dimension_numbers = #tpu.dot_dimension_numbers<[1], [0], [0], [1], [0, 0, 1, 1], [], []>} : vector<16x32xf32>, vector<32x16xf32>, vector<16x16xf32> -> vector<16x16xf32>
    %45 = arith.addf %41, %44 : vector<16x16xf32>
    %c0_34 = arith.constant 0 : index
    %c0_35 = arith.constant 0 : index
    %46 = vector.load %arg9[%c0_34, %c0_35] : memref<1x16xf32, #tpu.memory_space<vmem>>, vector<1x16xf32>
    %47 = vector.broadcast %46 : vector<1x16xf32> to vector<16x16xf32>
    %48 = arith.addf %45, %47 : vector<16x16xf32>
    %c0_36 = arith.constant 0 : index
    %c0_37 = arith.constant 0 : index
    %49 = vector.load %arg10[%c0_36, %c0_37] : memref<1x16xf32, #tpu.memory_space<vmem>>, vector<1x16xf32>
    %50 = vector.broadcast %49 : vector<1x16xf32> to vector<16x16xf32>
    %51 = arith.mulf %48, %50 : vector<16x16xf32>
    %c0_38 = arith.constant 0 : index
    %c0_39 = arith.constant 0 : index
    %52 = vector.load %arg11[%c0_38, %c0_39] : memref<1x16xf32, #tpu.memory_space<vmem>>, vector<1x16xf32>
    %53 = vector.broadcast %52 : vector<1x16xf32> to vector<16x16xf32>
    %54 = arith.addf %51, %53 : vector<16x16xf32>
    %cst_40 = arith.constant 0.000000e+00 : f32
    %55 = vector.broadcast %cst_40 : f32 to vector<16x16xf32>
    %56 = arith.maximumf %54, %55 : vector<16x16xf32>
    %c0_41 = arith.constant 0 : index
    %c0_42 = arith.constant 0 : index
    %57 = vector.load %arg9[%c0_41, %c0_42] : memref<1x16xf32, #tpu.memory_space<vmem>>, vector<1x16xf32>
    %c0_43 = arith.constant 0 : index
    %c0_44 = arith.constant 0 : index
    %58 = vector.load %arg10[%c0_43, %c0_44] : memref<1x16xf32, #tpu.memory_space<vmem>>, vector<1x16xf32>
    %59 = arith.mulf %57, %58 : vector<1x16xf32>
    %c0_45 = arith.constant 0 : index
    %c0_46 = arith.constant 0 : index
    %60 = vector.load %arg11[%c0_45, %c0_46] : memref<1x16xf32, #tpu.memory_space<vmem>>, vector<1x16xf32>
    %61 = arith.addf %59, %60 : vector<1x16xf32>
    %cst_47 = arith.constant 0.000000e+00 : f32
    %62 = vector.broadcast %cst_47 : f32 to vector<1x16xf32>
    %63 = arith.maximumf %61, %62 : vector<1x16xf32>
    %c15_i32_48 = arith.constant 15 : i32
    %64 = tpu.dynamic_rotate %56 by %c15_i32_48 dim 0 : vector<16x16xf32>, i32 -> vector<16x16xf32>
    %65 = arith.maximumf %56, %64 : vector<16x16xf32>
    %c0_49 = arith.constant 0 : index
    %c0_50 = arith.constant 0 : index
    %66 = vector.load %arg13[%c0_49, %c0_50] : memref<8x16xf32, #tpu.memory_space<vmem>>, vector<8x16xf32>
    %cst_51 = arith.constant dense<0.000000e+00> : vector<8x16xf32>
    %67 = tpu.matmul %66, %65, %cst_51 {dimension_numbers = #tpu.dot_dimension_numbers<[1], [0], [0], [1], [0, 0, 1, 1], [], []>} : vector<8x16xf32>, vector<16x16xf32>, vector<8x16xf32> -> vector<8x16xf32>
    %68 = vector.broadcast %63 : vector<1x16xf32> to vector<8x16xf32>
    %69 = arith.maximumf %67, %68 : vector<8x16xf32>
    %70 = vector.extract_strided_slice %69 {offsets = [0, 0], sizes = [2, 16], strides = [1, 1]} : vector<8x16xf32> to vector<2x16xf32>
    %c0_52 = arith.constant 0 : index
    %c0_53 = arith.constant 0 : index
    %c0_54 = arith.constant 0 : index
    %71 = vector.load %arg16[%c0_52, %c0_53, %c0_54] : memref<4x16x32xf32, #tpu.memory_space<vmem>>, vector<1x16x32xf32>
    %72 = vector.shape_cast %71 : vector<1x16x32xf32> to vector<16x32xf32>
    %cst_55 = arith.constant dense<0.000000e+00> : vector<2x32xf32>
    %73 = tpu.matmul %70, %72, %cst_55 {dimension_numbers = #tpu.dot_dimension_numbers<[1], [0], [0], [1], [0, 0, 1, 1], [], []>} : vector<2x16xf32>, vector<16x32xf32>, vector<2x32xf32> -> vector<2x32xf32>
    %74 = vector.extract_strided_slice %69 {offsets = [2, 0], sizes = [2, 16], strides = [1, 1]} : vector<8x16xf32> to vector<2x16xf32>
    %c1_56 = arith.constant 1 : index
    %c0_57 = arith.constant 0 : index
    %c0_58 = arith.constant 0 : index
    %75 = vector.load %arg16[%c1_56, %c0_57, %c0_58] : memref<4x16x32xf32, #tpu.memory_space<vmem>>, vector<1x16x32xf32>
    %76 = vector.shape_cast %75 : vector<1x16x32xf32> to vector<16x32xf32>
    %cst_59 = arith.constant dense<0.000000e+00> : vector<2x32xf32>
    %77 = tpu.matmul %74, %76, %cst_59 {dimension_numbers = #tpu.dot_dimension_numbers<[1], [0], [0], [1], [0, 0, 1, 1], [], []>} : vector<2x16xf32>, vector<16x32xf32>, vector<2x32xf32> -> vector<2x32xf32>
    %78 = vector.extract_strided_slice %69 {offsets = [4, 0], sizes = [2, 16], strides = [1, 1]} : vector<8x16xf32> to vector<2x16xf32>
    %c2_60 = arith.constant 2 : index
    %c0_61 = arith.constant 0 : index
    %c0_62 = arith.constant 0 : index
    %79 = vector.load %arg16[%c2_60, %c0_61, %c0_62] : memref<4x16x32xf32, #tpu.memory_space<vmem>>, vector<1x16x32xf32>
    %80 = vector.shape_cast %79 : vector<1x16x32xf32> to vector<16x32xf32>
    %cst_63 = arith.constant dense<0.000000e+00> : vector<2x32xf32>
    %81 = tpu.matmul %78, %80, %cst_63 {dimension_numbers = #tpu.dot_dimension_numbers<[1], [0], [0], [1], [0, 0, 1, 1], [], []>} : vector<2x16xf32>, vector<16x32xf32>, vector<2x32xf32> -> vector<2x32xf32>
    %82 = vector.extract_strided_slice %69 {offsets = [6, 0], sizes = [2, 16], strides = [1, 1]} : vector<8x16xf32> to vector<2x16xf32>
    %c3 = arith.constant 3 : index
    %c0_64 = arith.constant 0 : index
    %c0_65 = arith.constant 0 : index
    %83 = vector.load %arg16[%c3, %c0_64, %c0_65] : memref<4x16x32xf32, #tpu.memory_space<vmem>>, vector<1x16x32xf32>
    %84 = vector.shape_cast %83 : vector<1x16x32xf32> to vector<16x32xf32>
    %cst_66 = arith.constant dense<0.000000e+00> : vector<2x32xf32>
    %85 = tpu.matmul %82, %84, %cst_66 {dimension_numbers = #tpu.dot_dimension_numbers<[1], [0], [0], [1], [0, 0, 1, 1], [], []>} : vector<2x16xf32>, vector<16x32xf32>, vector<2x32xf32> -> vector<2x32xf32>
    %86 = arith.addf %73, %77 : vector<2x32xf32>
    %87 = arith.addf %81, %85 : vector<2x32xf32>
    %88 = arith.addf %86, %87 : vector<2x32xf32>
    %c0_67 = arith.constant 0 : index
    %c0_68 = arith.constant 0 : index
    %89 = vector.load %arg17[%c0_67, %c0_68] : memref<1x32xf32, #tpu.memory_space<vmem>>, vector<1x32xf32>
    %90 = vector.broadcast %89 : vector<1x32xf32> to vector<2x32xf32>
    %91 = arith.addf %88, %90 : vector<2x32xf32>
    %92 = math.tanh %91 : vector<2x32xf32>
    %c0_69 = arith.constant 0 : index
    %c0_70 = arith.constant 0 : index
    %93 = vector.load %arg18[%c0_69, %c0_70] : memref<32x32xf32, #tpu.memory_space<vmem>>, vector<32x32xf32>
    %cst_71 = arith.constant dense<0.000000e+00> : vector<2x32xf32>
    %94 = tpu.matmul %92, %93, %cst_71 {dimension_numbers = #tpu.dot_dimension_numbers<[1], [0], [0], [1], [0, 0, 1, 1], [], []>} : vector<2x32xf32>, vector<32x32xf32>, vector<2x32xf32> -> vector<2x32xf32>
    %c0_72 = arith.constant 0 : index
    %c0_73 = arith.constant 0 : index
    %95 = vector.load %arg19[%c0_72, %c0_73] : memref<1x32xf32, #tpu.memory_space<vmem>>, vector<1x32xf32>
    %96 = vector.broadcast %95 : vector<1x32xf32> to vector<2x32xf32>
    %97 = arith.addf %94, %96 : vector<2x32xf32>
    %98 = math.tanh %97 : vector<2x32xf32>
    %c0_74 = arith.constant 0 : index
    %c0_75 = arith.constant 0 : index
    %99 = vector.load %arg20[%c0_74, %c0_75] : memref<32x16xf32, #tpu.memory_space<vmem>>, vector<32x16xf32>
    %cst_76 = arith.constant dense<0.000000e+00> : vector<2x16xf32>
    %100 = tpu.matmul %98, %99, %cst_76 {dimension_numbers = #tpu.dot_dimension_numbers<[1], [0], [0], [1], [0, 0, 1, 1], [], []>} : vector<2x32xf32>, vector<32x16xf32>, vector<2x16xf32> -> vector<2x16xf32>
    %c0_77 = arith.constant 0 : index
    %c0_78 = arith.constant 0 : index
    %101 = vector.load %arg21[%c0_77, %c0_78] : memref<1x16xf32, #tpu.memory_space<vmem>>, vector<1x16xf32>
    %102 = vector.broadcast %101 : vector<1x16xf32> to vector<2x16xf32>
    %103 = arith.addf %100, %102 : vector<2x16xf32>
    %104 = math.tanh %103 : vector<2x16xf32>
    %c0_79 = arith.constant 0 : index
    %c0_80 = arith.constant 0 : index
    %105 = vector.load %arg3[%c0_79, %c0_80] : memref<64x3xf32, #tpu.memory_space<vmem>>, vector<64x3xf32>
    %c0_81 = arith.constant 0 : index
    %c0_82 = arith.constant 0 : index
    %106 = vector.load %arg22[%c0_81, %c0_82] : memref<3x32xf32, #tpu.memory_space<vmem>>, vector<3x32xf32>
    %cst_83 = arith.constant dense<0.000000e+00> : vector<64x32xf32>
    %107 = tpu.matmul %105, %106, %cst_83 {dimension_numbers = #tpu.dot_dimension_numbers<[1], [0], [0], [1], [0, 0, 1, 1], [], []>} : vector<64x3xf32>, vector<3x32xf32>, vector<64x32xf32> -> vector<64x32xf32>
    %c0_84 = arith.constant 0 : index
    %c0_85 = arith.constant 0 : index
    %108 = vector.load %arg23[%c0_84, %c0_85] : memref<1x32xf32, #tpu.memory_space<vmem>>, vector<1x32xf32>
    %109 = vector.broadcast %108 : vector<1x32xf32> to vector<64x32xf32>
    %110 = arith.addf %107, %109 : vector<64x32xf32>
    %c0_86 = arith.constant 0 : index
    %c0_87 = arith.constant 0 : index
    %111 = vector.load %arg24[%c0_86, %c0_87] : memref<1x32xf32, #tpu.memory_space<vmem>>, vector<1x32xf32>
    %112 = vector.broadcast %111 : vector<1x32xf32> to vector<64x32xf32>
    %113 = arith.mulf %110, %112 : vector<64x32xf32>
    %c0_88 = arith.constant 0 : index
    %c0_89 = arith.constant 0 : index
    %114 = vector.load %arg25[%c0_88, %c0_89] : memref<1x32xf32, #tpu.memory_space<vmem>>, vector<1x32xf32>
    %115 = vector.broadcast %114 : vector<1x32xf32> to vector<64x32xf32>
    %116 = arith.addf %113, %115 : vector<64x32xf32>
    %cst_90 = arith.constant 0.000000e+00 : f32
    %117 = vector.broadcast %cst_90 : f32 to vector<64x32xf32>
    %118 = arith.maximumf %116, %117 : vector<64x32xf32>
    %c0_91 = arith.constant 0 : index
    %c0_92 = arith.constant 0 : index
    %119 = vector.load %arg23[%c0_91, %c0_92] : memref<1x32xf32, #tpu.memory_space<vmem>>, vector<1x32xf32>
    %c0_93 = arith.constant 0 : index
    %c0_94 = arith.constant 0 : index
    %120 = vector.load %arg24[%c0_93, %c0_94] : memref<1x32xf32, #tpu.memory_space<vmem>>, vector<1x32xf32>
    %121 = arith.mulf %119, %120 : vector<1x32xf32>
    %c0_95 = arith.constant 0 : index
    %c0_96 = arith.constant 0 : index
    %122 = vector.load %arg25[%c0_95, %c0_96] : memref<1x32xf32, #tpu.memory_space<vmem>>, vector<1x32xf32>
    %123 = arith.addf %121, %122 : vector<1x32xf32>
    %cst_97 = arith.constant 0.000000e+00 : f32
    %124 = vector.broadcast %cst_97 : f32 to vector<1x32xf32>
    %125 = arith.maximumf %123, %124 : vector<1x32xf32>
    %c63_i32 = arith.constant 63 : i32
    %126 = tpu.dynamic_rotate %118 by %c63_i32 dim 0 : vector<64x32xf32>, i32 -> vector<64x32xf32>
    %127 = arith.maximumf %118, %126 : vector<64x32xf32>
    %c0_98 = arith.constant 0 : index
    %c0_99 = arith.constant 0 : index
    %128 = vector.load %arg30[%c0_98, %c0_99] : memref<32x64xf32, #tpu.memory_space<vmem>>, vector<32x64xf32>
    %cst_100 = arith.constant dense<0.000000e+00> : vector<32x32xf32>
    %129 = tpu.matmul %128, %127, %cst_100 {dimension_numbers = #tpu.dot_dimension_numbers<[1], [0], [0], [1], [0, 0, 1, 1], [], []>} : vector<32x64xf32>, vector<64x32xf32>, vector<32x32xf32> -> vector<32x32xf32>
    %130 = vector.broadcast %125 : vector<1x32xf32> to vector<32x32xf32>
    %131 = arith.maximumf %129, %130 : vector<32x32xf32>
    %c1_i32_101 = arith.constant 1 : i32
    %132 = tpu.dynamic_rotate %131 by %c1_i32_101 dim 0 : vector<32x32xf32>, i32 -> vector<32x32xf32>
    %c0_102 = arith.constant 0 : index
    %c0_103 = arith.constant 0 : index
    %133 = vector.load %arg32[%c0_102, %c0_103] : memref<32x1xf32, #tpu.memory_space<vmem>>, vector<32x1xf32>
    %134 = vector.broadcast %133 : vector<32x1xf32> to vector<32x32xf32>
    %135 = arith.mulf %132, %134 : vector<32x32xf32>
    %c31_i32_104 = arith.constant 31 : i32
    %136 = tpu.dynamic_rotate %131 by %c31_i32_104 dim 0 : vector<32x32xf32>, i32 -> vector<32x32xf32>
    %c0_105 = arith.constant 0 : index
    %c0_106 = arith.constant 0 : index
    %137 = vector.load %arg33[%c0_105, %c0_106] : memref<32x1xf32, #tpu.memory_space<vmem>>, vector<32x1xf32>
    %138 = vector.broadcast %137 : vector<32x1xf32> to vector<32x32xf32>
    %139 = arith.mulf %136, %138 : vector<32x32xf32>
    %c0_107 = arith.constant 0 : index
    %c0_108 = arith.constant 0 : index
    %c0_109 = arith.constant 0 : index
    %140 = vector.load %arg26[%c0_107, %c0_108, %c0_109] : memref<3x32x16xf32, #tpu.memory_space<vmem>>, vector<1x32x16xf32>
    %141 = vector.shape_cast %140 : vector<1x32x16xf32> to vector<32x16xf32>
    %cst_110 = arith.constant dense<0.000000e+00> : vector<32x16xf32>
    %142 = tpu.matmul %135, %141, %cst_110 {dimension_numbers = #tpu.dot_dimension_numbers<[1], [0], [0], [1], [0, 0, 1, 1], [], []>} : vector<32x32xf32>, vector<32x16xf32>, vector<32x16xf32> -> vector<32x16xf32>
    %c1_111 = arith.constant 1 : index
    %c0_112 = arith.constant 0 : index
    %c0_113 = arith.constant 0 : index
    %143 = vector.load %arg26[%c1_111, %c0_112, %c0_113] : memref<3x32x16xf32, #tpu.memory_space<vmem>>, vector<1x32x16xf32>
    %144 = vector.shape_cast %143 : vector<1x32x16xf32> to vector<32x16xf32>
    %cst_114 = arith.constant dense<0.000000e+00> : vector<32x16xf32>
    %145 = tpu.matmul %131, %144, %cst_114 {dimension_numbers = #tpu.dot_dimension_numbers<[1], [0], [0], [1], [0, 0, 1, 1], [], []>} : vector<32x32xf32>, vector<32x16xf32>, vector<32x16xf32> -> vector<32x16xf32>
    %146 = arith.addf %142, %145 : vector<32x16xf32>
    %c2_115 = arith.constant 2 : index
    %c0_116 = arith.constant 0 : index
    %c0_117 = arith.constant 0 : index
    %147 = vector.load %arg26[%c2_115, %c0_116, %c0_117] : memref<3x32x16xf32, #tpu.memory_space<vmem>>, vector<1x32x16xf32>
    %148 = vector.shape_cast %147 : vector<1x32x16xf32> to vector<32x16xf32>
    %cst_118 = arith.constant dense<0.000000e+00> : vector<32x16xf32>
    %149 = tpu.matmul %139, %148, %cst_118 {dimension_numbers = #tpu.dot_dimension_numbers<[1], [0], [0], [1], [0, 0, 1, 1], [], []>} : vector<32x32xf32>, vector<32x16xf32>, vector<32x16xf32> -> vector<32x16xf32>
    %150 = arith.addf %146, %149 : vector<32x16xf32>
    %c0_119 = arith.constant 0 : index
    %c0_120 = arith.constant 0 : index
    %151 = vector.load %arg27[%c0_119, %c0_120] : memref<1x16xf32, #tpu.memory_space<vmem>>, vector<1x16xf32>
    %152 = vector.broadcast %151 : vector<1x16xf32> to vector<32x16xf32>
    %153 = arith.addf %150, %152 : vector<32x16xf32>
    %c0_121 = arith.constant 0 : index
    %c0_122 = arith.constant 0 : index
    %154 = vector.load %arg28[%c0_121, %c0_122] : memref<1x16xf32, #tpu.memory_space<vmem>>, vector<1x16xf32>
    %155 = vector.broadcast %154 : vector<1x16xf32> to vector<32x16xf32>
    %156 = arith.mulf %153, %155 : vector<32x16xf32>
    %c0_123 = arith.constant 0 : index
    %c0_124 = arith.constant 0 : index
    %157 = vector.load %arg29[%c0_123, %c0_124] : memref<1x16xf32, #tpu.memory_space<vmem>>, vector<1x16xf32>
    %158 = vector.broadcast %157 : vector<1x16xf32> to vector<32x16xf32>
    %159 = arith.addf %156, %158 : vector<32x16xf32>
    %cst_125 = arith.constant 0.000000e+00 : f32
    %160 = vector.broadcast %cst_125 : f32 to vector<32x16xf32>
    %161 = arith.maximumf %159, %160 : vector<32x16xf32>
    %c0_126 = arith.constant 0 : index
    %c0_127 = arith.constant 0 : index
    %162 = vector.load %arg27[%c0_126, %c0_127] : memref<1x16xf32, #tpu.memory_space<vmem>>, vector<1x16xf32>
    %c0_128 = arith.constant 0 : index
    %c0_129 = arith.constant 0 : index
    %163 = vector.load %arg28[%c0_128, %c0_129] : memref<1x16xf32, #tpu.memory_space<vmem>>, vector<1x16xf32>
    %164 = arith.mulf %162, %163 : vector<1x16xf32>
    %c0_130 = arith.constant 0 : index
    %c0_131 = arith.constant 0 : index
    %165 = vector.load %arg29[%c0_130, %c0_131] : memref<1x16xf32, #tpu.memory_space<vmem>>, vector<1x16xf32>
    %166 = arith.addf %164, %165 : vector<1x16xf32>
    %cst_132 = arith.constant 0.000000e+00 : f32
    %167 = vector.broadcast %cst_132 : f32 to vector<1x16xf32>
    %168 = arith.maximumf %166, %167 : vector<1x16xf32>
    %c31_i32_133 = arith.constant 31 : i32
    %169 = tpu.dynamic_rotate %161 by %c31_i32_133 dim 0 : vector<32x16xf32>, i32 -> vector<32x16xf32>
    %170 = arith.maximumf %161, %169 : vector<32x16xf32>
    %c0_134 = arith.constant 0 : index
    %c0_135 = arith.constant 0 : index
    %171 = vector.load %arg31[%c0_134, %c0_135] : memref<16x32xf32, #tpu.memory_space<vmem>>, vector<16x32xf32>
    %cst_136 = arith.constant dense<0.000000e+00> : vector<16x16xf32>
    %172 = tpu.matmul %171, %170, %cst_136 {dimension_numbers = #tpu.dot_dimension_numbers<[1], [0], [0], [1], [0, 0, 1, 1], [], []>} : vector<16x32xf32>, vector<32x16xf32>, vector<16x16xf32> -> vector<16x16xf32>
    %173 = vector.broadcast %168 : vector<1x16xf32> to vector<16x16xf32>
    %174 = arith.maximumf %172, %173 : vector<16x16xf32>
    %175 = vector.extract_strided_slice %174 {offsets = [0, 0], sizes = [2, 16], strides = [1, 1]} : vector<16x16xf32> to vector<2x16xf32>
    %c0_137 = arith.constant 0 : index
    %c0_138 = arith.constant 0 : index
    %c0_139 = arith.constant 0 : index
    %176 = vector.load %arg34[%c0_137, %c0_138, %c0_139] : memref<8x16x32xf32, #tpu.memory_space<vmem>>, vector<1x16x32xf32>
    %177 = vector.shape_cast %176 : vector<1x16x32xf32> to vector<16x32xf32>
    %cst_140 = arith.constant dense<0.000000e+00> : vector<2x32xf32>
    %178 = tpu.matmul %175, %177, %cst_140 {dimension_numbers = #tpu.dot_dimension_numbers<[1], [0], [0], [1], [0, 0, 1, 1], [], []>} : vector<2x16xf32>, vector<16x32xf32>, vector<2x32xf32> -> vector<2x32xf32>
    %179 = vector.extract_strided_slice %174 {offsets = [2, 0], sizes = [2, 16], strides = [1, 1]} : vector<16x16xf32> to vector<2x16xf32>
    %c1_141 = arith.constant 1 : index
    %c0_142 = arith.constant 0 : index
    %c0_143 = arith.constant 0 : index
    %180 = vector.load %arg34[%c1_141, %c0_142, %c0_143] : memref<8x16x32xf32, #tpu.memory_space<vmem>>, vector<1x16x32xf32>
    %181 = vector.shape_cast %180 : vector<1x16x32xf32> to vector<16x32xf32>
    %cst_144 = arith.constant dense<0.000000e+00> : vector<2x32xf32>
    %182 = tpu.matmul %179, %181, %cst_144 {dimension_numbers = #tpu.dot_dimension_numbers<[1], [0], [0], [1], [0, 0, 1, 1], [], []>} : vector<2x16xf32>, vector<16x32xf32>, vector<2x32xf32> -> vector<2x32xf32>
    %183 = vector.extract_strided_slice %174 {offsets = [4, 0], sizes = [2, 16], strides = [1, 1]} : vector<16x16xf32> to vector<2x16xf32>
    %c2_145 = arith.constant 2 : index
    %c0_146 = arith.constant 0 : index
    %c0_147 = arith.constant 0 : index
    %184 = vector.load %arg34[%c2_145, %c0_146, %c0_147] : memref<8x16x32xf32, #tpu.memory_space<vmem>>, vector<1x16x32xf32>
    %185 = vector.shape_cast %184 : vector<1x16x32xf32> to vector<16x32xf32>
    %cst_148 = arith.constant dense<0.000000e+00> : vector<2x32xf32>
    %186 = tpu.matmul %183, %185, %cst_148 {dimension_numbers = #tpu.dot_dimension_numbers<[1], [0], [0], [1], [0, 0, 1, 1], [], []>} : vector<2x16xf32>, vector<16x32xf32>, vector<2x32xf32> -> vector<2x32xf32>
    %187 = vector.extract_strided_slice %174 {offsets = [6, 0], sizes = [2, 16], strides = [1, 1]} : vector<16x16xf32> to vector<2x16xf32>
    %c3_149 = arith.constant 3 : index
    %c0_150 = arith.constant 0 : index
    %c0_151 = arith.constant 0 : index
    %188 = vector.load %arg34[%c3_149, %c0_150, %c0_151] : memref<8x16x32xf32, #tpu.memory_space<vmem>>, vector<1x16x32xf32>
    %189 = vector.shape_cast %188 : vector<1x16x32xf32> to vector<16x32xf32>
    %cst_152 = arith.constant dense<0.000000e+00> : vector<2x32xf32>
    %190 = tpu.matmul %187, %189, %cst_152 {dimension_numbers = #tpu.dot_dimension_numbers<[1], [0], [0], [1], [0, 0, 1, 1], [], []>} : vector<2x16xf32>, vector<16x32xf32>, vector<2x32xf32> -> vector<2x32xf32>
    %191 = vector.extract_strided_slice %174 {offsets = [8, 0], sizes = [2, 16], strides = [1, 1]} : vector<16x16xf32> to vector<2x16xf32>
    %c4 = arith.constant 4 : index
    %c0_153 = arith.constant 0 : index
    %c0_154 = arith.constant 0 : index
    %192 = vector.load %arg34[%c4, %c0_153, %c0_154] : memref<8x16x32xf32, #tpu.memory_space<vmem>>, vector<1x16x32xf32>
    %193 = vector.shape_cast %192 : vector<1x16x32xf32> to vector<16x32xf32>
    %cst_155 = arith.constant dense<0.000000e+00> : vector<2x32xf32>
    %194 = tpu.matmul %191, %193, %cst_155 {dimension_numbers = #tpu.dot_dimension_numbers<[1], [0], [0], [1], [0, 0, 1, 1], [], []>} : vector<2x16xf32>, vector<16x32xf32>, vector<2x32xf32> -> vector<2x32xf32>
    %195 = vector.extract_strided_slice %174 {offsets = [10, 0], sizes = [2, 16], strides = [1, 1]} : vector<16x16xf32> to vector<2x16xf32>
    %c5 = arith.constant 5 : index
    %c0_156 = arith.constant 0 : index
    %c0_157 = arith.constant 0 : index
    %196 = vector.load %arg34[%c5, %c0_156, %c0_157] : memref<8x16x32xf32, #tpu.memory_space<vmem>>, vector<1x16x32xf32>
    %197 = vector.shape_cast %196 : vector<1x16x32xf32> to vector<16x32xf32>
    %cst_158 = arith.constant dense<0.000000e+00> : vector<2x32xf32>
    %198 = tpu.matmul %195, %197, %cst_158 {dimension_numbers = #tpu.dot_dimension_numbers<[1], [0], [0], [1], [0, 0, 1, 1], [], []>} : vector<2x16xf32>, vector<16x32xf32>, vector<2x32xf32> -> vector<2x32xf32>
    %199 = vector.extract_strided_slice %174 {offsets = [12, 0], sizes = [2, 16], strides = [1, 1]} : vector<16x16xf32> to vector<2x16xf32>
    %c6 = arith.constant 6 : index
    %c0_159 = arith.constant 0 : index
    %c0_160 = arith.constant 0 : index
    %200 = vector.load %arg34[%c6, %c0_159, %c0_160] : memref<8x16x32xf32, #tpu.memory_space<vmem>>, vector<1x16x32xf32>
    %201 = vector.shape_cast %200 : vector<1x16x32xf32> to vector<16x32xf32>
    %cst_161 = arith.constant dense<0.000000e+00> : vector<2x32xf32>
    %202 = tpu.matmul %199, %201, %cst_161 {dimension_numbers = #tpu.dot_dimension_numbers<[1], [0], [0], [1], [0, 0, 1, 1], [], []>} : vector<2x16xf32>, vector<16x32xf32>, vector<2x32xf32> -> vector<2x32xf32>
    %203 = vector.extract_strided_slice %174 {offsets = [14, 0], sizes = [2, 16], strides = [1, 1]} : vector<16x16xf32> to vector<2x16xf32>
    %c7 = arith.constant 7 : index
    %c0_162 = arith.constant 0 : index
    %c0_163 = arith.constant 0 : index
    %204 = vector.load %arg34[%c7, %c0_162, %c0_163] : memref<8x16x32xf32, #tpu.memory_space<vmem>>, vector<1x16x32xf32>
    %205 = vector.shape_cast %204 : vector<1x16x32xf32> to vector<16x32xf32>
    %cst_164 = arith.constant dense<0.000000e+00> : vector<2x32xf32>
    %206 = tpu.matmul %203, %205, %cst_164 {dimension_numbers = #tpu.dot_dimension_numbers<[1], [0], [0], [1], [0, 0, 1, 1], [], []>} : vector<2x16xf32>, vector<16x32xf32>, vector<2x32xf32> -> vector<2x32xf32>
    %207 = arith.addf %178, %182 : vector<2x32xf32>
    %208 = arith.addf %186, %190 : vector<2x32xf32>
    %209 = arith.addf %194, %198 : vector<2x32xf32>
    %210 = arith.addf %202, %206 : vector<2x32xf32>
    %211 = arith.addf %207, %208 : vector<2x32xf32>
    %212 = arith.addf %209, %210 : vector<2x32xf32>
    %213 = arith.addf %211, %212 : vector<2x32xf32>
    %c0_165 = arith.constant 0 : index
    %c0_166 = arith.constant 0 : index
    %214 = vector.load %arg35[%c0_165, %c0_166] : memref<1x32xf32, #tpu.memory_space<vmem>>, vector<1x32xf32>
    %215 = vector.broadcast %214 : vector<1x32xf32> to vector<2x32xf32>
    %216 = arith.addf %213, %215 : vector<2x32xf32>
    %217 = math.tanh %216 : vector<2x32xf32>
    %c0_167 = arith.constant 0 : index
    %c0_168 = arith.constant 0 : index
    %218 = vector.load %arg36[%c0_167, %c0_168] : memref<32x32xf32, #tpu.memory_space<vmem>>, vector<32x32xf32>
    %cst_169 = arith.constant dense<0.000000e+00> : vector<2x32xf32>
    %219 = tpu.matmul %217, %218, %cst_169 {dimension_numbers = #tpu.dot_dimension_numbers<[1], [0], [0], [1], [0, 0, 1, 1], [], []>} : vector<2x32xf32>, vector<32x32xf32>, vector<2x32xf32> -> vector<2x32xf32>
    %c0_170 = arith.constant 0 : index
    %c0_171 = arith.constant 0 : index
    %220 = vector.load %arg37[%c0_170, %c0_171] : memref<1x32xf32, #tpu.memory_space<vmem>>, vector<1x32xf32>
    %221 = vector.broadcast %220 : vector<1x32xf32> to vector<2x32xf32>
    %222 = arith.addf %219, %221 : vector<2x32xf32>
    %223 = math.tanh %222 : vector<2x32xf32>
    %c0_172 = arith.constant 0 : index
    %c0_173 = arith.constant 0 : index
    %224 = vector.load %arg38[%c0_172, %c0_173] : memref<32x16xf32, #tpu.memory_space<vmem>>, vector<32x16xf32>
    %cst_174 = arith.constant dense<0.000000e+00> : vector<2x16xf32>
    %225 = tpu.matmul %223, %224, %cst_174 {dimension_numbers = #tpu.dot_dimension_numbers<[1], [0], [0], [1], [0, 0, 1, 1], [], []>} : vector<2x32xf32>, vector<32x16xf32>, vector<2x16xf32> -> vector<2x16xf32>
    %c0_175 = arith.constant 0 : index
    %c0_176 = arith.constant 0 : index
    %226 = vector.load %arg39[%c0_175, %c0_176] : memref<1x16xf32, #tpu.memory_space<vmem>>, vector<1x16xf32>
    %227 = vector.broadcast %226 : vector<1x16xf32> to vector<2x16xf32>
    %228 = arith.addf %225, %227 : vector<2x16xf32>
    %229 = math.tanh %228 : vector<2x16xf32>
    %c0_177 = arith.constant 0 : index
    %c0_178 = arith.constant 0 : index
    %230 = vector.load %arg40[%c0_177, %c0_178] : memref<80x32xf32, #tpu.memory_space<vmem>>, vector<80x32xf32>
    %c0_179 = arith.constant 0 : index
    %c0_180 = arith.constant 0 : index
    %231 = vector.load %arg0[%c0_179, %c0_180] : memref<2x16xf32, #tpu.memory_space<vmem>>, vector<2x16xf32>
    %232 = vector.extract_strided_slice %230 {offsets = [0, 0], sizes = [16, 32], strides = [1, 1]} : vector<80x32xf32> to vector<16x32xf32>
    %cst_181 = arith.constant dense<0.000000e+00> : vector<2x32xf32>
    %233 = tpu.matmul %231, %232, %cst_181 {dimension_numbers = #tpu.dot_dimension_numbers<[1], [0], [0], [1], [0, 0, 1, 1], [], []>} : vector<2x16xf32>, vector<16x32xf32>, vector<2x32xf32> -> vector<2x32xf32>
    %c0_182 = arith.constant 0 : index
    %c0_183 = arith.constant 0 : index
    %234 = vector.load %arg1[%c0_182, %c0_183] : memref<2x32xf32, #tpu.memory_space<vmem>>, vector<2x32xf32>
    %235 = vector.extract_strided_slice %230 {offsets = [16, 0], sizes = [32, 32], strides = [1, 1]} : vector<80x32xf32> to vector<32x32xf32>
    %cst_184 = arith.constant dense<0.000000e+00> : vector<2x32xf32>
    %236 = tpu.matmul %234, %235, %cst_184 {dimension_numbers = #tpu.dot_dimension_numbers<[1], [0], [0], [1], [0, 0, 1, 1], [], []>} : vector<2x32xf32>, vector<32x32xf32>, vector<2x32xf32> -> vector<2x32xf32>
    %237 = arith.addf %233, %236 : vector<2x32xf32>
    %238 = vector.extract_strided_slice %230 {offsets = [48, 0], sizes = [16, 32], strides = [1, 1]} : vector<80x32xf32> to vector<16x32xf32>
    %cst_185 = arith.constant dense<0.000000e+00> : vector<2x32xf32>
    %239 = tpu.matmul %104, %238, %cst_185 {dimension_numbers = #tpu.dot_dimension_numbers<[1], [0], [0], [1], [0, 0, 1, 1], [], []>} : vector<2x16xf32>, vector<16x32xf32>, vector<2x32xf32> -> vector<2x32xf32>
    %240 = arith.addf %237, %239 : vector<2x32xf32>
    %241 = vector.extract_strided_slice %230 {offsets = [64, 0], sizes = [16, 32], strides = [1, 1]} : vector<80x32xf32> to vector<16x32xf32>
    %cst_186 = arith.constant dense<0.000000e+00> : vector<2x32xf32>
    %242 = tpu.matmul %229, %241, %cst_186 {dimension_numbers = #tpu.dot_dimension_numbers<[1], [0], [0], [1], [0, 0, 1, 1], [], []>} : vector<2x16xf32>, vector<16x32xf32>, vector<2x32xf32> -> vector<2x32xf32>
    %243 = arith.addf %240, %242 : vector<2x32xf32>
    %c0_187 = arith.constant 0 : index
    %c0_188 = arith.constant 0 : index
    %244 = vector.load %arg41[%c0_187, %c0_188] : memref<1x32xf32, #tpu.memory_space<vmem>>, vector<1x32xf32>
    %245 = vector.broadcast %244 : vector<1x32xf32> to vector<2x32xf32>
    %246 = arith.addf %243, %245 : vector<2x32xf32>
    %c0_189 = arith.constant 0 : index
    %c0_190 = arith.constant 0 : index
    %247 = vector.load %arg44[%c0_189, %c0_190] : memref<2x32xf32, #tpu.memory_space<vmem>>, vector<2x32xf32>
    tpu.vector_store %arg44[%c0_189, %c0_190], %246 {strides = array<i32>} : memref<2x32xf32, #tpu.memory_space<vmem>>, vector<2x32xf32>,
    %c0_191 = arith.constant 0 : index
    %c0_192 = arith.constant 0 : index
    %248 = vector.load %arg42[%c0_191, %c0_192] : memref<32x32xf32, #tpu.memory_space<vmem>>, vector<32x32xf32>
    %249 = vector.extract_strided_slice %248 {offsets = [0, 0], sizes = [16, 32], strides = [1, 1]} : vector<32x32xf32> to vector<16x32xf32>
    %cst_193 = arith.constant dense<0.000000e+00> : vector<2x32xf32>
    %250 = tpu.matmul %104, %249, %cst_193 {dimension_numbers = #tpu.dot_dimension_numbers<[1], [0], [0], [1], [0, 0, 1, 1], [], []>} : vector<2x16xf32>, vector<16x32xf32>, vector<2x32xf32> -> vector<2x32xf32>
    %251 = vector.extract_strided_slice %248 {offsets = [16, 0], sizes = [16, 32], strides = [1, 1]} : vector<32x32xf32> to vector<16x32xf32>
    %cst_194 = arith.constant dense<0.000000e+00> : vector<2x32xf32>
    %252 = tpu.matmul %229, %251, %cst_194 {dimension_numbers = #tpu.dot_dimension_numbers<[1], [0], [0], [1], [0, 0, 1, 1], [], []>} : vector<2x16xf32>, vector<16x32xf32>, vector<2x32xf32> -> vector<2x32xf32>
    %253 = arith.addf %250, %252 : vector<2x32xf32>
    %c0_195 = arith.constant 0 : index
    %c0_196 = arith.constant 0 : index
    %254 = vector.load %arg43[%c0_195, %c0_196] : memref<1x32xf32, #tpu.memory_space<vmem>>, vector<1x32xf32>
    %255 = vector.broadcast %254 : vector<1x32xf32> to vector<2x32xf32>
    %256 = arith.addf %253, %255 : vector<2x32xf32>
    %c0_197 = arith.constant 0 : index
    %c0_198 = arith.constant 0 : index
    %257 = vector.load %arg45[%c0_197, %c0_198] : memref<2x32xf32, #tpu.memory_space<vmem>>, vector<2x32xf32>
    tpu.vector_store %arg45[%c0_197, %c0_198], %256 {strides = array<i32>} : memref<2x32xf32, #tpu.memory_space<vmem>>, vector<2x32xf32>,
    return
  }
}

</mosaic_0001>

<bundles_post_ra>
// kernel: encoder_forward.1
= control target key start
LH: loop header
LB: loop body
LE: loop exit
PB: predicated region body
PF: predicated region fallthrough
CT: control target
= control target key end

     0   :  { %s4212_s6 = smov 1   ;;  %s4213_s10 = smov 2   ;;  %s4910_s0 = inlined_call_operand.smem [shape: u32[46], index: -1, kind: input, shape index: {}] }
   0x1   :  { %s4270_s5 = sld [smem:[%s4910_s0]]   ;;  %s4214_s14 = smov 3  }
   0x2   :  { %s4275_s9 = sld [smem:[%s4910_s0 + %s4212_s6]]   ;;  %s4215_s18 = smov 4  }
   0x3   :  { %s4280_s13 = sld [smem:[%s4910_s0 + %s4213_s10]]   ;;  %s4216_s22 = smov 5  }
   0x4   :  { %s4285_s17 = sld [smem:[%s4910_s0 + %s4214_s14]]   ;;  %s4217_s26 = smov 6  }
   0x5   :  { %s4290_s21 = sld [smem:[%s4910_s0 + %s4215_s18]]   ;;  %s4218_s30 = smov 7  }
   0x6   :  { %s4295_s25 = sld [smem:[%s4910_s0 + %s4216_s22]]   ;;  %s4219_s4 = smov 8  }
   0x7   :  { %4922 = sst [smem:[#allocation8_spill]] %s4270_s5  ;;  %s4220_s10 = smov 9  }
   0x8   :  { %4923 = sst [smem:[#allocation9_spill]] %s4275_s9  ;;  %s4221_s15 = smov 10  }
   0x9   :  { %s4300_s29 = sld [smem:[%s4910_s0 + %s4217_s26]]   ;;  %s4222_s20 = smov 11  }
   0xa   :  { %4924 = sst [smem:[#allocation10_spill]] %s4285_s17  ;;  %s4223_s26 = smov 12  }
   0xb   :  { %s4305_s3 = sld [smem:[%s4910_s0 + %s4218_s30]]   ;;  %s4224_s1 = smov 13  }
   0xc   :  { %s4310_s8 = sld [smem:[%s4910_s0 + %s4219_s4]]   ;;  %s4225_s7 = smov 14  }
   0xd   :  { %s4315_s14 = sld [smem:[%s4910_s0 + %s4220_s10]]   ;;  %s4227_s22 = smov 16  }
   0xe   :  { %s4320_s19 = sld [smem:[%s4910_s0 + %s4221_s15]]   ;;  %s4226_s15 = smov 15  }
   0xf   :  { %s4325_s24 = sld [smem:[%s4910_s0 + %s4222_s20]]   ;;  %s4228_s28 = smov 17  }
  0x10   :  { %s4330_s30 = sld [smem:[%s4910_s0 + %s4223_s26]]  }
  0x11   :  { %s4335_s6 = sld [smem:[%s4910_s0 + %s4224_s1]]  }
  0x12   :  { %s4340_s12 = sld [smem:[%s4910_s0 + %s4225_s7]]   ;;  %s4229_s7 = smov 18  }
  0x13   :  { %s4345_s20 = sld [smem:[%s4910_s0 + %s4226_s15]]   ;;  %s4230_s15 = smov 19  }
  0x14   :  { %s4350_s27 = sld [smem:[%s4910_s0 + %s4227_s22]]   ;;  %s4231_s22 = smov 20  }
  0x15   :  { %s4355_s4 = sld [smem:[%s4910_s0 + %s4228_s28]]   ;;  %s4232_s28 = smov 21  }
  0x16   :  { %s4360_s5 = sld [smem:[%s4910_s0 + %s4229_s7]]   ;;  %s4233_s7 = smov 22  }
  0x17   :  { %4925 = sst [smem:[#allocation11_spill]] %s4335_s6 }
  0x18   :  { %s4365_s9 = sld [smem:[%s4910_s0 + %s4230_s15]]   ;;  %s4234_s15 = smov 23  }
  0x19   :  { %s4370_s17 = sld [smem:[%s4910_s0 + %s4231_s22]]   ;;  %s4235_s22 = smov 24  }
  0x1a   :  { %4926 = sst [smem:[#allocation12_spill]] %s4350_s27 }
  0x1b   :  { %4927 = sst [smem:[#allocation13_spill]] %s4355_s4 }
  0x1c   :  { %4928 = sst [smem:[#allocation14_spill]] %s4360_s5 }
  0x1d   :  { %s4375_s4 = sld [smem:[%s4910_s0 + %s4232_s28]]   ;;  %s4236_s28 = smov 25  }
  0x1e   :  { %4929 = sst [smem:[#allocation15_spill]] %s4365_s9 }
  0x1f   :  { %4930 = sst [smem:[#allocation16_spill]] %s4370_s17 }
  0x20   :  { %s4380_s5 = sld [smem:[%s4910_s0 + %s4233_s7]]   ;;  %s4237_s7 = smov 26  }
  0x21   :  { %s4385_s9 = sld [smem:[%s4910_s0 + %s4234_s15]]   ;;  %s4238_s15 = smov 27  }
  0x22   :  { %s4390_s17 = sld [smem:[%s4910_s0 + %s4235_s22]]   ;;  %s4239_s22 = smov 28  }
  0x23   :  { %4931 = sst [smem:[#allocation17_spill]] %s4375_s4 }
  0x24   :  { %s4395_s4 = sld [smem:[%s4910_s0 + %s4236_s28]]   ;;  %s4240_s28 = smov 29  }
  0x26   :  { %4932 = sst [smem:[#allocation18_spill]] %s4380_s5 }
  0x27   :  { %4933 = sst [smem:[#allocation19_spill]] %s4385_s9 }
  0x28   :  { %4934 = sst [smem:[#allocation20_spill]] %s4390_s17 }
  0x29   :  { %s4400_s5 = sld [smem:[%s4910_s0 + %s4237_s7]]   ;;  %s4241_s7 = smov 30  }
  0x2a   :  { %4935 = sst [smem:[#allocation21_spill]] %s4395_s4 }
  0x2b   :  { %s4405_s9 = sld [smem:[%s4910_s0 + %s4238_s15]]   ;;  %s4242_s15 = smov 31  }
  0x2c   :  { %s4410_s17 = sld [smem:[%s4910_s0 + %s4239_s22]]   ;;  %s4243_s22 = smov 32  }
  0x2d   :  { %s4415_s4 = sld [smem:[%s4910_s0 + %s4240_s28]]   ;;  %s4244_s28 = smov 33  }
  0x2f   :  { %4936 = sst [smem:[#allocation22_spill]] %s4400_s5 }
  0x30   :  { %s4420_s5 = sld [smem:[%s4910_s0 + %s4241_s7]]   ;;  %s4245_s7 = smov 34  }
  0x31   :  { %4937 = sst [smem:[#allocation23_spill]] %s4405_s9 }
  0x32   :  { %4938 = sst [smem:[#allocation24_spill]] %s4410_s17 }
  0x33   :  { %4939 = sst [smem:[#allocation25_spill]] %s4415_s4 }
  0x34   :  { %s4425_s9 = sld [smem:[%s4910_s0 + %s4242_s15]]   ;;  %s4246_s15 = smov 35  }
  0x35   :  { %s4430_s17 = sld [smem:[%s4910_s0 + %s4243_s22]]   ;;  %s4247_s22 = smov 36  }
  0x36   :  { %4940 = sst [smem:[#allocation26_spill]] %s4420_s5 }
  0x37   :  { %s4435_s4 = sld [smem:[%s4910_s0 + %s4244_s28]]   ;;  %s4248_s28 = smov 37  }
  0x38   :  { %s4440_s5 = sld [smem:[%s4910_s0 + %s4245_s7]]   ;;  %s4249_s7 = smov 38  }
  0x39   :  { %s4450_s27 = sld [smem:[%s4910_s0 + %s4247_s22]]   ;;  %s4251_s22 = smov 40  }
  0x3a   :  { %4941 = sst [smem:[#allocation27_spill]] %s4425_s9 }
  0x3b   :  { %s4445_s9 = sld [smem:[%s4910_s0 + %s4246_s15]]   ;;  %s4250_s15 = smov 39  }
  0x3c   :  { %s4455_s6 = sld [smem:[%s4910_s0 + %s4248_s28]]   ;;  %s4252_s28 = smov 41  }
  0x3e   :  { %4942 = sst [smem:[#allocation28_spill]] %s4440_s5 }
  0x3f   :  { %4944 = sst [smem:[#allocation30_spill]] %s4450_s27 }
  0x40   :  { %s4460_s5 = sld [smem:[%s4910_s0 + %s4249_s7]]   ;;  %s4253_s7 = smov 42  }
  0x41   :  { %4943 = sst [smem:[#allocation29_spill]] %s4445_s9 }
  0x42   :  { %4945 = sst [smem:[#allocation31_spill]] %s4455_s6 }
  0x43   :  { %s4465_s9 = sld [smem:[%s4910_s0 + %s4250_s15]]   ;;  %s4254_s15 = smov 43  }
  0x44   :  { %s4470_s27 = sld [smem:[%s4910_s0 + %s4251_s22]]   ;;  %s4255_s22 = smov 44  }
  0x45   :  { %s4475_s6 = sld [smem:[%s4910_s0 + %s4252_s28]]   ;;  %s4256_s28 = smov 45  }
  0x46   :  { %4946 = sst [smem:[#allocation32_spill]] %s4460_s5 }
  0x47   :  { %s4480_s5 = sld [smem:[%s4910_s0 + %s4253_s7]]  }
  0x49   :  { %4947 = sst [smem:[#allocation33_spill]] %s4465_s9 }
  0x4a   :  { %4948 = sst [smem:[#allocation34_spill]] %s4470_s27 }
  0x4b   :  { %4949 = sst [smem:[#allocation35_spill]] %s4475_s6 }
  0x4c   :  { %s4485_s9 = sld [smem:[%s4910_s0 + %s4254_s15]]  }
  0x4d   :  { %s4490_s27 = sld [smem:[%s4910_s0 + %s4255_s22]]  }
  0x4e   :  { %s4495_s6 = sld [smem:[%s4910_s0 + %s4256_s28]]  }
  0x4f   :  { %97 = vsyncpa [#allocation3], 0  ;;  %v191_v0 = vld [vmem:[%s4290_s21] sm:$0x7]  ;;  %vm212_vm0 = vcmask 1042432   ;;  %vm199_vm1 = vcmask 23552  }
  0x50   :  { %v187_v1 = vld [vmem:[%s4280_s13] sm:$0xff]  ;;  %v188_v2 = vld [vmem:[%s4280_s13 + $0x8] sm:$0xff]  ;;  %3782 = vmatprep.subr.msk.mxu0 %vm212_vm0, %v191_v0  ;;  %v189_v3 = vld [vmem:[%s4280_s13 + $0x10] sm:$0xff] }
  0x51   :  { %3784 = vmatprep.mubr.msk.f32.mxu0 %vm199_vm1, %v187_v1  ;;  %3783 = vmatpush3.msk.msra.mxu0 %vm212_vm0, %v191_v0 }
  0x52   :  { %98 = vsyncpa [#allocation5], 0  ;;  %3785 = vmatmul.mubr.msk.f32.vlgmr.msra.gmra.mxu0 %vm199_vm1, %v188_v2  ;;  %v190_v4 = vld [vmem:[%s4280_s13 + $0x18] sm:$0xff]  ;;  %v345_v5 = vld [vmem:[%s4330_s30] sm:$0xff]  ;;  %vm347_vm2 = vcmask 261120   ;;  %v4257_v8 = vmov 0   ;;  %v194_v26 = vlaneseq }
  0x53   :  { %3787 = vmatprep.mubr.msk.f32.mxu0 %vm199_vm1, %v189_v3  ;;  %3798 = vmatprep.mubr.msk.f32.mxu1 %vm347_vm2, %v345_v5  ;;  %v442_v6 = vld [vmem:[%s4340_s12] sm:$0xff]  ;;  %v443_v9 = vld [vmem:[%s4340_s12 + $0x8] sm:$0xff]  ;;  %v3526_v13 = vld [vmem:[%s4310_s8 + $0x38] sm:$0xff]  ;;  %vm4259_vm5 = vmmov 0   ;;  %s4950_s0 = sld [smem:[#allocation11_spill]]  ;;  %vm772_vm6 = vcmask 130048  }
  0x54   :  { %v460_v7 = vld [vmem:[%s4345_s20] sm:$0xff]  ;;  %4154 = vset.pattern.permute.xlu0 %v4257_v8  ;;  %4155 = vset.pattern.permute.xlu1 %v4257_v8  ;;  %v461_v10 = vld [vmem:[%s4345_s20 + $0x8] sm:$0xff]  ;;  %v3525_v14 = vld [vmem:[%s4310_s8 + $0x30] sm:$0xff]  ;;  %v4529_v27 = vshrl.u32 %v194_v26, 7  ;;  %s4951_s13 = sld [smem:[#allocation12_spill]]  ;;  %vm1553_vm7 = vcmask 523264  }
  0x55   :  { %446 = vperm.xlu0 %4154, %v442_v6   ;;  %464 = vperm.xlu1 %4155, %v460_v7   ;;  %v1669_v11 = vld [vmem:[%s4430_s17] sm:$0xff]  ;;  %v1670_v12 = vld [vmem:[%s4430_s17 + $0x8] sm:$0xff]  ;;  %v1671_v21 = vld [vmem:[%s4430_s17 + $0x10] sm:$0xff]  ;;  %s4953_s21 = sld [smem:[#allocation18_spill]]  ;;  %vm3288_vm8 = vcmask 254976  }
  0x56   :  { %3788 = vmatmul.mubr.msk.f32.gmra.mxu0 %vm199_vm1, %v190_v4  ;;  %v1705_v15 = vld [vmem:[%s4435_s4] sm:$0xff]  ;;  %v1706_v16 = vld [vmem:[%s4435_s4 + $0x8] sm:$0xff]  ;;  %3801 = vmatprep.subr.mxu0 %v3526_v13  ;;  %v1672_v22 = vld [vmem:[%s4430_s17 + $0x18] sm:$0xff]  ;;  %v4532_v28 = vsub.s32 0, %v4529_v27  ;;  %vm336_vm3 = vcmp.lt.s32.totalorder %v4529_v27, 7  ;;  %vm439_vm4 = vcmp.lt.s32.totalorder %v4529_v27, 1 }
  0x57   :  { %v192_v17 = vld [vmem:[%s4295_s25] sm:$0x1]  ;;  %3802 = vmatpush3.msra.mxu0 %v3526_v13  ;;  %v1707_v24 = vld [vmem:[%s4435_s4 + $0x10] sm:$0xff]  ;;  %v1708_v25 = vld [vmem:[%s4435_s4 + $0x18] sm:$0xff]  ;;  %s4952_s17 = sld [smem:[#allocation14_spill]] }
  0x58   :  { %v301_v18 = vld [vmem:[%s4300_s29] sm:$0x1]  ;;  %3803 = vmatprep.subr.mxu0 %v3525_v14  ;;  %v197_v29 = vrot.slane %v192_v17, %v4532_v28  ;;  %v346_v0 = vld [vmem:[%s4330_s30 + $0x8] sm:$0xff]  ;;  %v477_v3 = vld [vmem:[%s4310_s8 + $0x18] sm:$0xff]  ;;  %s4954_s25 = sld [smem:[#allocation13_spill]] }
  0x59   :  { %451 = vperm.xlu0 %4154, %v443_v9   ;;  %469 = vperm.xlu1 %4155, %v461_v10   ;;  %v327_v19 = vmul.f32 %v301_v18, %v192_v17  ;;  %v312_v20 = vld [vmem:[%s4305_s3] sm:$0x1]  ;;  %v306_v30 = vrot.slane %v301_v18, %v4532_v28  ;;  %v3524_v1 = vld [vmem:[%s4310_s8 + $0x28] sm:$0xff]  ;;  %v476_v4 = vld [vmem:[%s4310_s8 + $0x10] sm:$0xff]  ;;  %s4955_s29 = sld [smem:[#allocation10_spill]] }
  0x5a   :  { %3804 = vmatpush3.msra.mxu0 %v3525_v14  ;;  %v317_v35 = vrot.slane %v312_v20, %v4532_v28  ;;  %v3523_v2 = vld [vmem:[%s4310_s8 + $0x20] sm:$0xff]  ;;  %v3534_v5 = vld [vmem:[%s4310_s8 + $0x58] sm:$0xff]  ;;  %v475_v6 = vld [vmem:[%s4310_s8 + $0x8] sm:$0xff]  ;;  %s4956_s3 = sld [smem:[#allocation16_spill]] }
  0x5b   :  { %v4525_v23 = vadd.f32 %v327_v19, %v312_v20  ;;  %3805 = vmatprep.subr.mxu0 %v3524_v1  ;;  %v474_v7 = vld [vmem:[%s4310_s8] sm:$0xff]  ;;  %v3533_v20 = vld [vmem:[%s4310_s8 + $0x50] sm:$0xff]  ;;  %s4961_s30 = sld [smem:[#allocation26_spill]] }
  0x5c   :  { %3806 = vmatpush3.msra.mxu0 %v3524_v1  ;;  %s4962_s12 = sld [smem:[#allocation22_spill]] }
  0x5d   :  { %1675 = vperm.xlu0 %4154, %v1669_v11   ;;  %1680 = vperm.xlu1 %4155, %v1670_v12   ;;  %v329_v8 = vmax.f32 %v4525_v23, 0.0  ;;  %v3532_v23 = vld [vmem:[%s4310_s8 + $0x48] sm:$0xff]  ;;  %s4963_s20 = sld [smem:[#allocation23_spill]] }
  0x5e   :  { %3807 = vmatprep.subr.mxu0 %v3523_v2  ;;  %s4964_s4 = sld [smem:[#allocation24_spill]] }
  0x5f   :  { %3808 = vmatpush3.msra.mxu0 %v3523_v2  ;;  %v433_v9 = vrot.slane %v329_v8, %v4532_v28  ;;  %v3543_v8 = vld [vmem:[%s4951_s13 + $0x30] sm:$0xff]  ;;  %s4965_s7 = sld [smem:[#allocation27_spill]] }
  0x60   :  { %3823 = vmatprep.subr.mxu0 %v3534_v5  ;;  %s4966_s10 = sld [smem:[#allocation25_spill]] }
  0x61   :  { %1711 = vperm.xlu0 %4154, %v1705_v15   ;;  %1716 = vperm.xlu1 %4155, %v1706_v16   ;;  %s4967_s11 = sld [smem:[#allocation28_spill]] }
  0x62   :  { %s4968_s15 = sld [smem:[#allocation30_spill]] }
  0x63   :  { %s4969_s16 = sld [smem:[#allocation29_spill]] }
  0x64   :  { %s4970_s18 = sld [smem:[#allocation32_spill]] }
  0x65   :  { %1685 = vperm.xlu0 %4154, %v1671_v21   ;;  %1690 = vperm.xlu1 %4155, %v1672_v22   ;;  %s4971_s22 = sld [smem:[#allocation34_spill]] }
  0x66   :  { %s4972_s23 = sld [smem:[#allocation9_spill]] }
  0x67   :  { %v3589_v27 = vld [vmem:[%s4967_s11 + $0x18] sm:$0xff]  ;;  %s4973_s26 = sld [smem:[#allocation31_spill]] }
  0x68   :  { %s4974_s28 = sld [smem:[#allocation17_spill]] }
  0x69   :  { %1721 = vperm.xlu0 %4154, %v1707_v24   ;;  %1726 = vperm.xlu1 %4155, %v1708_v25   ;;  %s4975_s1 = sld [smem:[#allocation8_spill]] }
  0x6a   :  { %s4976_s2 = sld [smem:[#allocation33_spill]] }
  0xd0   :  { %v447_v11 = vpop.permute.xlu0 %446  ;;  %v465_v15 = vpop.permute.xlu1 %464 }
  0xd4   :  { %v452_v21 = vpop.permute.xlu0 %451 }
 0x112   :  { %v3786_v31 = vpop.f32.mrf.mxu0 }
 0x113   :  { %v288_v32 = vadd.f32 %v3786_v31, %v197_v29 }
 0x114   :  { %v282_v33 = vpop.f32.mrf.mxu0 }
 0x115   :  { %v309_v34 = vmul.f32 %v306_v30, %v288_v32  ;;  %v283_v36 = vadd.f32 %v282_v33, %v197_v29  ;;  %v3531_v32 = vld [vmem:[%s4310_s8 + $0x40] sm:$0xff]  ;;  %v470_v33 = vpop.permute.xlu1 %469  ;;  %s4957_s8 = sld [smem:[#allocation15_spill]] }
 0x116   :  { %v3789_v37 = vpop.f32.mrf.mxu0 }
 0x117   :  { %v308_v38 = vmul.f32 %v306_v30, %v283_v36  ;;  %v298_v39 = vadd.f32 %v3789_v37, %v197_v29  ;;  %v320_v41 = vadd.f32 %v317_v35, %v309_v34  ;;  %v742_v36 = vld [vmem:[%s4320_s19] sm:$0x1]  ;;  %s4959_s19 = sld [smem:[#allocation20_spill]] }
 0x118   :  { %v292_v40 = vpop.f32.mrf.mxu0 }
 0x119   :  { %v319_v42 = vadd.f32 %v317_v35, %v308_v38  ;;  %v311_v43 = vmul.f32 %v306_v30, %v298_v39  ;;  %v293_v44 = vadd.f32 %v292_v40, %v197_v29  ;;  %v324_v48 = vmax.f32 %v320_v41, 0.0  ;;  %v751_v39 = vld [vmem:[%s4325_s24] sm:$0x1]  ;;  %s4960_s24 = sld [smem:[#allocation21_spill]] }
 0x11a   :  { %v4258_v38 = vmov 0.0  }
 0x11b   :  { %v323_v45 = vmax.f32 %v319_v42, 0.0  ;;  %v310_v46 = vmul.f32 %v306_v30, %v293_v44  ;;  %v322_v47 = vadd.f32 %v317_v35, %v311_v43  ;;  %v331_v54 = vrot.slane %v324_v48, 1 }
 0x11d   :  { %v321_v49 = vadd.f32 %v317_v35, %v310_v46  ;;  %v326_v50 = vmax.f32 %v322_v47, 0.0  ;;  %v330_v52 = vrot.slane %v323_v45, 1  ;;  %v733_v35 = vld [vmem:[%s4315_s14] sm:$0x1]  ;;  %s4958_s14 = sld [smem:[#allocation19_spill]] }
 0x11e   :  { %v762_v37 = vmul.f32 %v742_v36, %v733_v35 }
 0x11f   :  { %v325_v51 = vmax.f32 %v321_v49, 0.0  ;;  %v333_v53 = vrot.slane %v326_v50, 1  ;;  %v339_v61 = vsel %vm336_vm3, %v330_v52, %v331_v54 }
 0x120   :  { %v341_v63 = vmax.f32 %v323_v45, %v339_v61  ;;  %v763_v40 = vadd.f32 %v762_v37, %v751_v39  ;;  %v738_v45 = vrot.slane %v733_v35, %v4532_v28 }
 0x121   :  { %v332_v55 = vrot.slane %v325_v51, 1  ;;  %v340_v56 = vsel %vm336_vm3, %v333_v53, %v330_v52 }
 0x122   :  { %v344_v57 = vmax.f32 %v326_v50, %v340_v56  ;;  %v747_v50 = vrot.slane %v742_v36, %v4532_v28  ;;  %v3548_v36 = vld [vmem:[%s4954_s25] ss:$0 sm:$0xff] }
 0x123   :  { %v337_v58 = vsel %vm336_vm3, %v332_v55, %v333_v53  ;;  %v338_v59 = vsel %vm336_vm3, %v331_v54, %v332_v55  ;;  %v756_v53 = vrot.slane %v751_v39, %v4532_v28 }
 0x124   :  { %3790 = vmatprep.subr.mxu1 %v344_v57  ;;  %v343_v60 = vmax.f32 %v325_v51, %v337_v58  ;;  %v342_v62 = vmax.f32 %v324_v48, %v338_v59 }
 0x125   :  { %3791 = vmatpush3.msra.mxu1 %v344_v57 }
 0x126   :  { %3792 = vmatprep.subr.mxu1 %v343_v60 }
 0x127   :  { %3793 = vmatpush3.msra.mxu1 %v343_v60 }
 0x128   :  { %3794 = vmatprep.subr.mxu1 %v342_v62 }
 0x129   :  { %3795 = vmatpush3.msra.mxu1 %v342_v62 }
 0x12a   :  { %3796 = vmatprep.subr.mxu1 %v341_v63 }
 0x12b   :  { %3797 = vmatpush3.msra.mxu1 %v341_v63 }
 0x12c   :  { %3799 = vmatmul.mubr.msk.f32.vlgmr.msra.gmra.mxu1 %vm347_vm2, %v346_v0  ;;  %3812 = vmatprep.subr.mxu1 %v477_v3 }
 0x12d   :  { %3813 = vmatpush3.msra.mxu1 %v477_v3 }
 0x12e   :  { %3814 = vmatprep.subr.mxu1 %v476_v4 }
 0x12f   :  { %3815 = vmatpush3.msra.mxu1 %v476_v4  ;;  %v771_v4 = vld [vmem:[%s4950_s0] sm:$0xff]  ;;  %s4977_s0 = sld [smem:[#allocation35_spill]] }
 0x130   :  { %3816 = vmatprep.subr.mxu1 %v475_v6 }
 0x131   :  { %3817 = vmatpush3.msra.mxu1 %v475_v6  ;;  %v3544_v6 = vld [vmem:[%s4951_s13 + $0x38] sm:$0xff] }
 0x132   :  { %3818 = vmatprep.subr.mxu1 %v474_v7 }
 0x133   :  { %3819 = vmatpush3.msra.mxu1 %v474_v7  ;;  %v3538_v7 = vld [vmem:[%s4951_s13 + $0x10] sm:$0xff] }
 0x134   :  { %3834 = vmatprep.subr.mxu1 %v4258_v38 }
 0x1ec   :  { %v3800_v10 = vpop.f32.mrf.mxu1 }
 0x1ed   :  { %v436_v12 = vmax.f32 %v3800_v10, %v433_v9 }
 0x1ee   :  { %v420_v13 = vpop.f32.mrf.mxu1 }
 0x1ef   :  { %v435_v14 = vmax.f32 %v420_v13, %v433_v9  ;;  %v438_v16 = vrot.slane %v436_v12, 7  ;;  %v457_v17 = vrot.slane %v436_v12, 1  ;;  %v764_v9 = vmax.f32 %v763_v40, 0.0 }
 0x1f1   :  { %v437_v18 = vrot.slane %v435_v14, 7  ;;  %v456_v19 = vrot.slane %v435_v14, 1  ;;  %3809 = vmatprep.mubr.msk.f32.mxu0 %vm347_vm2, %v435_v14  ;;  %v850_v10 = vrot.slane %v764_v9, %v4532_v28 }
 0x1f2   :  { %3810 = vmatmul.mubr.msk.f32.vlgmr.msra.gmra.mxu0 %vm347_vm2, %v436_v12 }
 0x1f3   :  { %v440_v22 = vsel %vm439_vm4, %v437_v18, %v438_v16  ;;  %3824 = vmatpush3.msra.mxu0 %v3534_v5  ;;  %v441_v24 = vsel %vm439_vm4, %v438_v16, %v437_v18  ;;  %v458_v25 = vsel %vm336_vm3, %v456_v19, %v457_v17  ;;  %v459_v31 = vsel %vm336_vm3, %v457_v17, %v456_v19  ;;  %v3539_v5 = vld [vmem:[%s4951_s13 + $0x18] sm:$0xff]  ;;  %v854_v16 = vld [vmem:[%s4951_s13 + $0x8] sm:$0xff]  ;;  %v853_v18 = vld [vmem:[%s4951_s13] sm:$0xff] }
 0x1f4   :  { %v455_v26 = vmul.f32 %v452_v21, %v440_v22  ;;  %3825 = vmatprep.subr.mxu0 %v3533_v20  ;;  %v454_v29 = vmul.f32 %v447_v11, %v441_v24  ;;  %v472_v30 = vmul.f32 %v465_v15, %v458_v25  ;;  %v473_v34 = vmul.f32 %v470_v33, %v459_v31  ;;  %v3542_v17 = vld [vmem:[%s4951_s13 + $0x28] sm:$0xff]  ;;  %v3541_v19 = vld [vmem:[%s4951_s13 + $0x20] sm:$0xff]  ;;  %v1169_v21 = vld [vmem:[%s4952_s17 + $0x18] sm:$0xff]  ;;  %s4260_s13 = smov [#allocation2]  }
 0x1f5   :  { %3826 = vmatpush3.msra.mxu0 %v3533_v20  ;;  %v1168_v22 = vld [vmem:[%s4952_s17 + $0x10] sm:$0xff]  ;;  %v1166_v24 = vld [vmem:[%s4952_s17] sm:$0xff] }
 0x1f6   :  { %3827 = vmatprep.subr.mxu0 %v3532_v23  ;;  %3820 = vmatprep.mubr.msk.f32.mxu1 %vm347_vm2, %v454_v29  ;;  %v1344_v25 = vld [vmem:[%s4953_s21] sm:$0x7] }
 0x1f7   :  { %3828 = vmatpush3.msra.mxu0 %v3532_v23  ;;  %3831 = vmatprep.mubr.msk.f32.mxu0 %vm347_vm2, %v472_v30  ;;  %v1167_v23 = vld [vmem:[%s4952_s17 + $0x8] sm:$0xff]  ;;  %s3449_s17 = sshll.u32 %s4260_s13, 4  ;;  %s3450_s17 = int_to_ptr.vmem [resolvable:$true] %s3449_s17 }
 0x1f8   :  { %3821 = vmatmul.mubr.msk.f32.vlgmr.msra.gmra.mxu1 %vm347_vm2, %v455_v26  ;;  %3829 = vmatprep.subr.mxu0 %v3531_v32  ;;  %s4168_s25 = scalar_lea.vmem %s3450_s17, 32  ;;  %p4173_p1 = scmp.lt.s32.totalorder %s3450_s17, %s3450_s17 }
 0x1f9   :  { %3830 = vmatpush3.msra.mxu0 %v3531_v32  ;;  %3838 = vmatprep.mubr.msk.f32.mxu1 %vm4259_vm5, %v4258_v38  ;;  %p4169_p0 = scmp.ne.s32.totalorder %s3450_s17, %s4168_s25  ;;  %p4174_p2 = scmp.lt.s32.totalorder %s4168_s25, %s4168_s25 }
 0x1fa   :  { %3832 = vmatmul.mubr.msk.f32.vlgmr.msra.gmra.mxu0 %vm347_vm2, %v473_v34  ;;  %3841 = vmatprep.subr.mxu0 %v4258_v38 }
 0x1fb   :  { %3845 = vmatprep.mubr.msk.f32.mxu0 %vm4259_vm5, %v4258_v38  ;;  %3842 = vmatpush3.msra.mxu0 %v3539_v5  ;;  %p4175_p3 = por %p4174_p2, %p4173_p1 }
 0x1fc   :  { %3843 = vmatprep.subr.mxu0 %v4258_v38 }
 0x1fd   :  { %3844 = vmatpush3.msra.mxu0 %v3538_v7  ;;  %p4176_p4 = pnand %p4175_p3, %p4169_p0 }
 0x1fe   :  { %3855 = vmatprep.subr.mxu0 %v4258_v38 }
 0x2b2   :  { %v3811_v41 = vpop.f32.mrf.mxu0 }
 0x2b4   :  { %v555_v42 = vpop.f32.mrf.mxu0 }
 0x2b8   :  { %v3822_v43 = vpop.f32.mrf.mxu1 }
 0x2b9   :  { %v642_v44 = vadd.f32 %v3822_v43, %v3811_v41 }
 0x2ba   :  { %v636_v46 = vpop.f32.mrf.mxu1  ;;  %v3833_v47 = vpop.f32.mrf.mxu0 }
 0x2bb   :  { %v637_v48 = vadd.f32 %v636_v46, %v555_v42  ;;  %v732_v49 = vadd.f32 %v3833_v47, %v642_v44  ;;  %v1336_v42 = vld [vmem:[%s4955_s29] sm:$0xff]  ;;  %v1337_v44 = vld [vmem:[%s4955_s29 + $0x8] sm:$0xff]  ;;  %v1339_v46 = vld [vmem:[%s4955_s29 + $0x18] sm:$0xff] }
 0x2bc   :  { %v722_v51 = vpop.f32.mrf.mxu0  ;;  %v1340_v47 = vld [vmem:[%s4955_s29 + $0x20] sm:$0xff] }
 0x2bd   :  { %v741_v52 = vadd.f32 %v738_v45, %v732_v49  ;;  %v731_v54 = vadd.f32 %v722_v51, %v637_v48  ;;  %v1341_v48 = vld [vmem:[%s4955_s29 + $0x28] sm:$0xff]  ;;  %v1342_v49 = vld [vmem:[%s4955_s29 + $0x30] sm:$0xff]  ;;  %v1254_v51 = vld [vmem:[%s4956_s3 + $0x18] sm:$0xff] }
 0x2bf   :  { %v750_v55 = vmul.f32 %v747_v50, %v741_v52  ;;  %v740_v56 = vadd.f32 %v738_v45, %v731_v54  ;;  %v1338_v45 = vld [vmem:[%s4955_s29 + $0x10] sm:$0xff]  ;;  %v1251_v54 = vld [vmem:[%s4956_s3] sm:$0xff] }
 0x2c0   :  { %v1253_v52 = vld [vmem:[%s4956_s3 + $0x10] sm:$0xff] }
 0x2c1   :  { %v759_v57 = vadd.f32 %v756_v53, %v750_v55  ;;  %v749_v58 = vmul.f32 %v747_v50, %v740_v56  ;;  %v1343_v50 = vld [vmem:[%s4955_s29 + $0x38] sm:$0xff]  ;;  %v3549_v55 = vld [vmem:[%s4957_s8] ss:$0 sm:$0xff] }
 0x2c3   :  { %v761_v59 = vmax.f32 %v759_v57, 0.0  ;;  %v758_v60 = vadd.f32 %v756_v53, %v749_v58  ;;  %v1252_v53 = vld [vmem:[%s4956_s3 + $0x8] sm:$0xff] }
 0x2c5   :  { %v760_v61 = vmax.f32 %v758_v60, 0.0  ;;  %v766_v62 = vrot.slane %v761_v59, 1 }
 0x2c7   :  { %v765_v63 = vrot.slane %v760_v61, 1 }
 0x2c9   :  { %v768_v0 = vsel %vm336_vm3, %v766_v62, %v765_v63  ;;  %v767_v1 = vsel %vm336_vm3, %v765_v63, %v766_v62  ;;  %v4668_v63 = vld [vmem:[%s4959_s19] sm:$0x1] }
 0x2ca   :  { %v770_v2 = vmax.f32 %v761_v59, %v768_v0  ;;  %v769_v3 = vmax.f32 %v760_v61, %v767_v1  ;;  %v4663_v59 = vld [vmem:[%s4958_s14] sm:$0x1] }
 0x2cb   :  { %v1350_v62 = vrot.slane %v4663_v59, %v4532_v28 }
 0x2cc   :  { %3835 = vmatpush3.msra.mxu1 %v770_v2 }
 0x2cd   :  { %3836 = vmatprep.subr.mxu1 %v4258_v38 }
 0x2ce   :  { %3837 = vmatpush3.msra.mxu1 %v769_v3  ;;  %v1489_v3 = vrot.slane %v4668_v63, %v4532_v28 }
 0x2cf   :  { %3839 = vmatmul.mubr.msk.f32.vlgmr.msra.gmra.mxu1 %vm772_vm6, %v771_v4  ;;  %3848 = vmatprep.subr.mxu1 %v4258_v38  ;;  %v4673_v4 = vld [vmem:[%s4960_s24] sm:$0x1] }
 0x2d0   :  { %3852 = vmatprep.mubr.msk.f32.mxu1 %vm4259_vm5, %v4258_v38  ;;  %3849 = vmatpush3.msra.mxu1 %v3544_v6 }
 0x2d1   :  { %3850 = vmatprep.subr.mxu1 %v4258_v38 }
 0x2d2   :  { %3851 = vmatpush3.msra.mxu1 %v3543_v8 }
 0x2d3   :  { %3862 = vmatprep.subr.mxu1 %v4258_v38 }
 0x38f   :  { %v842_v11 = vpop.f32.mrf.mxu1 }
 0x390   :  { %v852_v12 = vmax.f32 %v842_v11, %v850_v10  ;;  %v1504_v11 = vrot.slane %v4673_v4, %v4532_v28 }
 0x391   :  { %v3840_v13 = vpop.f32.mrf.mxu1 }
 0x392   :  { %v859_v14 = vrot.slane %v852_v12, 2  ;;  %v938_v15 = vrot.slane %v852_v12, 6  ;;  %v1083_v20 = vrot.slane %v852_v12, 4  ;;  %v1549_v13 = vld [vmem:[%s4961_s30] sm:$0xff] }
 0x394   :  { %3846 = vmatmul.mubr.msk.f32.vlgmr.msra.gmra.mxu0 %vm772_vm6, %v859_v14  ;;  %3853 = vmatmul.mubr.msk.f32.vlgmr.msra.gmra.mxu1 %vm772_vm6, %v938_v15 }
 0x395   :  { %3856 = vmatpush3.msra.mxu0 %v854_v16  ;;  %3863 = vmatpush3.msra.mxu1 %v3542_v17 }
 0x396   :  { %3857 = vmatprep.subr.mxu0 %v4258_v38  ;;  %3864 = vmatprep.subr.mxu1 %v4258_v38 }
 0x397   :  { %3858 = vmatpush3.msra.mxu0 %v853_v18  ;;  %3859 = vmatprep.mubr.msk.f32.mxu0 %vm4259_vm5, %v4258_v38 }
 0x398   :  { %3865 = vmatpush3.msra.mxu1 %v3541_v19  ;;  %3866 = vmatprep.mubr.msk.f32.mxu1 %vm4259_vm5, %v4258_v38 }
 0x399   :  { %3860 = vmatmul.mubr.msk.f32.vlgmr.msra.gmra.mxu0 %vm772_vm6, %v852_v12  ;;  %3867 = vmatmul.mubr.msk.f32.vlgmr.msra.gmra.mxu1 %vm772_vm6, %v1083_v20 }
 0x39a   :  { %3869 = vmatprep.subr.mxu0 %v4258_v38  ;;  %3877 = vmatprep.mubr.msk.f32.mxu0 %vm4259_vm5, %v4258_v38 }
 0x39b   :  { %3880 = vmatprep.subr.mxu1 %v4258_v38  ;;  %3888 = vmatprep.mubr.msk.f32.mxu1 %vm4259_vm5, %v4258_v38 }
 0x39c   :  { %3870 = vmatpush3.msra.mxu0 %v1169_v21  ;;  %3881 = vmatpush3.msra.mxu1 %v1254_v51 }
 0x39d   :  { %3871 = vmatprep.subr.mxu0 %v4258_v38  ;;  %3882 = vmatprep.subr.mxu1 %v4258_v38 }
 0x39e   :  { %3872 = vmatpush3.msra.mxu0 %v1168_v22  ;;  %3883 = vmatpush3.msra.mxu1 %v1253_v52 }
 0x39f   :  { %3873 = vmatprep.subr.mxu0 %v4258_v38  ;;  %3884 = vmatprep.subr.mxu1 %v4258_v38 }
 0x3a0   :  { %3874 = vmatpush3.msra.mxu0 %v1167_v23  ;;  %3885 = vmatpush3.msra.mxu1 %v1252_v53 }
 0x3a1   :  { %3875 = vmatprep.subr.mxu0 %v4258_v38  ;;  %3886 = vmatprep.subr.mxu1 %v4258_v38 }
 0x3a2   :  { %3876 = vmatpush3.msra.mxu0 %v1166_v24  ;;  %3887 = vmatpush3.msra.mxu1 %v1251_v54 }
 0x3a3   :  { %3891 = vmatprep.subr.msk.mxu0 %vm212_vm0, %v1344_v25 }
 0x454   :  { %v928_v26 = vpop.f32.mrf.mxu0  ;;  %v1007_v29 = vpop.f32.mrf.mxu1 }
 0x456   :  { %v3847_v30 = vpop.f32.mrf.mxu0  ;;  %v3854_v31 = vpop.f32.mrf.mxu1 }
 0x459   :  { %v1079_v32 = vpop.f32.mrf.mxu0  ;;  %v1152_v33 = vpop.f32.mrf.mxu1 }
 0x45a   :  { %v1080_v34 = vadd.f32 %v1079_v32, %v928_v26  ;;  %v1153_v35 = vadd.f32 %v1152_v33, %v1007_v29 }
 0x45b   :  { %v3861_v37 = vpop.f32.mrf.mxu0  ;;  %v3868_v39 = vpop.f32.mrf.mxu1 }
 0x45c   :  { %v1156_v40 = vadd.f32 %v1153_v35, %v1080_v34 }
 0x45e   :  { %v1164_v41 = vadd.f32 %v3548_v36, %v1156_v40 }
 0x460   :  { %4156 = vtanh.f32 %v1164_v41 }
 0x46d   :  { %v4157_v43 = vpop.eup %4156 }
 0x46e   :  { %3878 = vmatmul.mubr.msk.f32.vlgmr.msra.gmra.mxu0 %vm347_vm2, %v4157_v43 }
 0x46f   :  { %3892 = vmatpush3.msk.msra.mxu0 %vm212_vm0, %v1344_v25  ;;  %3893 = vmatprep.mubr.msk.f32.mxu0 %vm199_vm1, %v1336_v42 }
 0x472   :  { %3894 = vmatmul.mubr.msk.f32.vlgmr.msra.gmra.mxu0 %vm199_vm1, %v1337_v44 }
 0x473   :  { %3896 = vmatprep.mubr.msk.f32.mxu0 %vm199_vm1, %v1338_v45 }
 0x476   :  { %3897 = vmatmul.mubr.msk.f32.gmra.mxu0 %vm199_vm1, %v1339_v46 }
 0x477   :  { %3899 = vmatprep.mubr.msk.f32.mxu0 %vm199_vm1, %v1340_v47 }
 0x47a   :  { %3900 = vmatmul.mubr.msk.f32.gmra.mxu0 %vm199_vm1, %v1341_v48 }
 0x47b   :  { %3902 = vmatprep.mubr.msk.f32.mxu0 %vm199_vm1, %v1342_v49 }
 0x47e   :  { %3903 = vmatmul.mubr.msk.f32.gmra.mxu0 %vm199_vm1, %v1343_v50 }
 0x52e   :  { %v1246_v56 = vpop.f32.mrf.mxu0 }
 0x52f   :  { %v1247_v57 = vadd.f32 %v3549_v55, %v1246_v56 }
 0x530   :  { %v3879_v58 = vpop.f32.mrf.mxu0 }
 0x531   :  { %4158 = vtanh.f32 %v1247_v57 }
 0x532   :  { %v3895_v60 = vpop.f32.mrf.mxu0 }
 0x533   :  { %v1451_v20 = vadd.f32 %v3895_v60, %v1350_v62 }
 0x534   :  { %v1445_v61 = vpop.f32.mrf.mxu0 }
 0x535   :  { %v1446_v1 = vadd.f32 %v1445_v61, %v1350_v62  ;;  %v1492_v33 = vmul.f32 %v1489_v3, %v1451_v20  ;;  %v1733_v20 = vld [vmem:[%s4962_s12] sm:$0xff] }
 0x536   :  { %v3898_v0 = vpop.f32.mrf.mxu0 }
 0x537   :  { %v1491_v6 = vmul.f32 %v1489_v3, %v1446_v1  ;;  %v1461_v7 = vadd.f32 %v3898_v0, %v1350_v62  ;;  %v1507_v44 = vadd.f32 %v1504_v11, %v1492_v33 }
 0x538   :  { %v1455_v2 = vpop.f32.mrf.mxu0 }
 0x539   :  { %v1456_v8 = vadd.f32 %v1455_v2, %v1350_v62  ;;  %v4678_v17 = vadd.f32 %v1504_v11, %v1491_v6  ;;  %v1494_v21 = vmul.f32 %v1489_v3, %v1461_v7  ;;  %v1515_v55 = vmax.f32 %v1507_v44, 0.0 }
 0x53a   :  { %v3901_v5 = vpop.f32.mrf.mxu0 }
 0x53b   :  { %v1471_v9 = vadd.f32 %v3901_v5, %v1350_v62  ;;  %v1493_v22 = vmul.f32 %v1489_v3, %v1456_v8  ;;  %v1514_v30 = vmax.f32 %v4678_v17, 0.0  ;;  %v1509_v34 = vadd.f32 %v1504_v11, %v1494_v21  ;;  %v3581_v17 = vld [vmem:[%s4962_s12 + $0x58] sm:$0xff] }
 0x53c   :  { %v1465_v10 = vpop.f32.mrf.mxu0  ;;  %v1526_v0 = vrot.slane %v1515_v55, 1 }
 0x53d   :  { %v1466_v12 = vadd.f32 %v1465_v10, %v1350_v62  ;;  %v1496_v15 = vmul.f32 %v1489_v3, %v1471_v9  ;;  %v1508_v35 = vadd.f32 %v1504_v11, %v1493_v22  ;;  %v1525_v41 = vrot.slane %v1514_v30, 1  ;;  %v1550_v9 = vld [vmem:[%s4961_s30 + $0x8] sm:$0xff]  ;;  %v1551_v10 = vld [vmem:[%s4961_s30 + $0x10] sm:$0xff] }
 0x53e   :  { %v4159_v14 = vpop.eup %4158  ;;  %v3904_v16 = vpop.f32.mrf.mxu0  ;;  %v1517_v45 = vmax.f32 %v1509_v34, 0.0 }
 0x53f   :  { %v1495_v18 = vmul.f32 %v1489_v3, %v1466_v12  ;;  %v1481_v19 = vadd.f32 %v3904_v16, %v1350_v62  ;;  %3889 = vmatmul.mubr.msk.f32.vlgmr.msra.gmra.mxu1 %vm347_vm2, %v4159_v14  ;;  %v1511_v24 = vadd.f32 %v1504_v11, %v1496_v15  ;;  %v1516_v46 = vmax.f32 %v1508_v35, 0.0  ;;  %v3569_v12 = vld [vmem:[%s4962_s12 + $0x38] sm:$0xff]  ;;  %v3567_v14 = vld [vmem:[%s4962_s12 + $0x28] sm:$0xff]  ;;  %v3566_v15 = vld [vmem:[%s4962_s12 + $0x20] sm:$0xff] }
 0x540   :  { %v1475_v23 = vpop.f32.mrf.mxu0  ;;  %3921 = vmatprep.mubr.msk.f32.mxu1 %vm1553_vm7, %v1549_v13  ;;  %v1528_v56 = vrot.slane %v1517_v45, 1  ;;  %v1539_v6 = vsel %vm336_vm3, %v1525_v41, %v1526_v0  ;;  %v3568_v13 = vld [vmem:[%s4962_s12 + $0x30] sm:$0xff]  ;;  %3927 = vmatprep.subr.mxu0 %v3569_v12  ;;  %v1736_v16 = vld [vmem:[%s4962_s12 + $0x18] sm:$0xff] }
 0x541   :  { %v1510_v25 = vadd.f32 %v1504_v11, %v1495_v18  ;;  %v1498_v26 = vmul.f32 %v1489_v3, %v1481_v19  ;;  %v1476_v29 = vadd.f32 %v1475_v23, %v1350_v62  ;;  %v1519_v36 = vmax.f32 %v1511_v24, 0.0  ;;  %3928 = vmatpush3.msra.mxu0 %v3569_v12  ;;  %v1735_v18 = vld [vmem:[%s4962_s12 + $0x10] sm:$0xff]  ;;  %v1734_v19 = vld [vmem:[%s4962_s12 + $0x8] sm:$0xff] }
 0x542   :  { %v1527_v57 = vrot.slane %v1516_v46, 1  ;;  %v1541_v8 = vmax.f32 %v1514_v30, %v1539_v6  ;;  %3929 = vmatprep.subr.mxu0 %v3568_v13  ;;  %v1522_v23 = vmul.f32 %v4668_v63, %v4663_v59 }
 0x543   :  { %v1513_v31 = vadd.f32 %v1504_v11, %v1498_v26  ;;  %v1497_v32 = vmul.f32 %v1489_v3, %v1476_v29  ;;  %v1518_v37 = vmax.f32 %v1510_v25, 0.0  ;;  %v1530_v47 = vrot.slane %v1519_v36, 1  ;;  %3930 = vmatpush3.msra.mxu0 %v3568_v13  ;;  %v1676_v25 = vpop.permute.xlu0 %1675  ;;  %v1681_v29 = vpop.permute.xlu1 %1680  ;;  %v2064_v13 = vld [vmem:[%s4966_s10] sm:$0x1] }
 0x544   :  { %v1537_v1 = vsel %vm336_vm3, %v1527_v57, %v1528_v56  ;;  %v1538_v3 = vsel %vm336_vm3, %v1526_v0, %v1527_v57  ;;  %3931 = vmatprep.subr.mxu0 %v3567_v14  ;;  %v1523_v24 = vadd.f32 %v1522_v23, %v4673_v4  ;;  %v3580_v4 = vld [vmem:[%s4962_s12 + $0x50] sm:$0xff] }
 0x545   :  { %v1521_v39 = vmax.f32 %v1513_v31, 0.0  ;;  %v1512_v40 = vadd.f32 %v1504_v11, %v1497_v32  ;;  %v1529_v48 = vrot.slane %v1518_v37, 1  ;;  %v1543_v5 = vmax.f32 %v1516_v46, %v1537_v1  ;;  %v1552_v11 = vld [vmem:[%s4961_s30 + $0x18] sm:$0xff]  ;;  %3932 = vmatpush3.msra.mxu0 %v3567_v14 }
 0x546   :  { %v1542_v7 = vmax.f32 %v1515_v55, %v1538_v3  ;;  %3933 = vmatprep.subr.mxu0 %v3566_v15  ;;  %v1524_v26 = vmax.f32 %v1523_v24, 0.0  ;;  %v3578_v55 = vld [vmem:[%s4962_s12 + $0x40] sm:$0xff] }
 0x547   :  { %v1532_v42 = vrot.slane %v1521_v39, 1  ;;  %v1520_v43 = vmax.f32 %v1512_v40, 0.0  ;;  %v1535_v58 = vsel %vm336_vm3, %v1529_v48, %v1530_v47  ;;  %v1536_v61 = vsel %vm336_vm3, %v1528_v56, %v1529_v48  ;;  %3934 = vmatpush3.msra.mxu0 %v3566_v15  ;;  %v1712_v31 = vpop.permute.xlu0 %1711  ;;  %v1717_v35 = vpop.permute.xlu1 %1716 }
 0x548   :  { %v1545_v62 = vmax.f32 %v1518_v37, %v1535_v58  ;;  %v1544_v2 = vmax.f32 %v1517_v45, %v1536_v61  ;;  %3955 = vmatprep.subr.mxu0 %v3581_v17  ;;  %v1655_v30 = vrot.slane %v1524_v26, %v4532_v28 }
 0x549   :  { %v1531_v49 = vrot.slane %v1520_v43, 1  ;;  %v1540_v50 = vsel %vm336_vm3, %v1532_v42, %v1525_v41 }
 0x54a   :  { %v1548_v51 = vmax.f32 %v1521_v39, %v1540_v50 }
 0x54b   :  { %v1533_v52 = vsel %vm336_vm3, %v1531_v49, %v1532_v42  ;;  %v1534_v53 = vsel %vm336_vm3, %v1530_v47, %v1531_v49  ;;  %v1686_v39 = vpop.permute.xlu0 %1685  ;;  %v3579_v47 = vld [vmem:[%s4962_s12 + $0x48] sm:$0xff]  ;;  %v1691_v50 = vpop.permute.xlu1 %1690 }
 0x54c   :  { %3905 = vmatprep.subr.mxu1 %v1548_v51  ;;  %v1547_v54 = vmax.f32 %v1520_v43, %v1533_v52  ;;  %v1546_v60 = vmax.f32 %v1519_v36, %v1534_v53 }
 0x54d   :  { %3906 = vmatpush3.msra.mxu1 %v1548_v51 }
 0x54e   :  { %3907 = vmatprep.subr.mxu1 %v1547_v54 }
 0x54f   :  { %3908 = vmatpush3.msra.mxu1 %v1547_v54  ;;  %v1722_v58 = vpop.permute.xlu0 %1721  ;;  %v1727_v6 = vpop.permute.xlu1 %1726 }
 0x550   :  { %3909 = vmatprep.subr.mxu1 %v1546_v60 }
 0x551   :  { %3910 = vmatpush3.msra.mxu1 %v1546_v60 }
 0x552   :  { %3911 = vmatprep.subr.mxu1 %v1545_v62 }
 0x553   :  { %3912 = vmatpush3.msra.mxu1 %v1545_v62 }
 0x554   :  { %3913 = vmatprep.subr.mxu1 %v1544_v2 }
 0x555   :  { %3914 = vmatpush3.msra.mxu1 %v1544_v2 }
 0x556   :  { %3915 = vmatprep.subr.mxu1 %v1543_v5 }
 0x557   :  { %3916 = vmatpush3.msra.mxu1 %v1543_v5 }
 0x558   :  { %3917 = vmatprep.subr.mxu1 %v1542_v7 }
 0x559   :  { %3918 = vmatpush3.msra.mxu1 %v1542_v7 }
 0x55a   :  { %3919 = vmatprep.subr.mxu1 %v1541_v8 }
 0x55b   :  { %3920 = vmatpush3.msra.mxu1 %v1541_v8 }
 0x55c   :  { %3922 = vmatmul.mubr.msk.f32.vlgmr.msra.gmra.mxu1 %vm1553_vm7, %v1550_v9  ;;  %3941 = vmatprep.subr.mxu1 %v1736_v16  ;;  %v2042_v9 = vld [vmem:[%s4963_s20] sm:$0x1] }
 0x55d   :  { %3924 = vmatprep.mubr.msk.f32.mxu1 %vm1553_vm7, %v1551_v10  ;;  %3942 = vmatpush3.msra.mxu1 %v1736_v16  ;;  %v2053_v10 = vld [vmem:[%s4964_s4] sm:$0x1]  ;;  %v2047_v23 = vrot.slane %v2042_v9, %v4532_v28 }
 0x55e   :  { %3943 = vmatprep.subr.mxu1 %v1735_v18  ;;  %v2079_v12 = vmul.f32 %v2053_v10, %v2042_v9  ;;  %v2058_v26 = vrot.slane %v2053_v10, %v4532_v28  ;;  %v3593_v9 = vld [vmem:[%s4967_s11 + $0x30] sm:$0xff] }
 0x55f   :  { %3944 = vmatpush3.msra.mxu1 %v1735_v18 }
 0x560   :  { %3925 = vmatmul.mubr.msk.f32.gmra.mxu1 %vm1553_vm7, %v1552_v11  ;;  %3945 = vmatprep.subr.mxu1 %v1734_v19  ;;  %v2094_v11 = vld [vmem:[%s4965_s7] sm:$0xff]  ;;  %v4759_v14 = vadd.f32 %v2079_v12, %v2064_v13 }
 0x561   :  { %3946 = vmatpush3.msra.mxu1 %v1734_v19 }
 0x562   :  { %3947 = vmatprep.subr.mxu1 %v1733_v20  ;;  %v2081_v10 = vmax.f32 %v4759_v14, 0.0  ;;  %v3603_v14 = vld [vmem:[%s4967_s11 + $0x70] sm:$0xff] }
 0x563   :  { %3948 = vmatpush3.msra.mxu1 %v1733_v20 }
 0x564   :  { %v2181_v12 = vrot.slane %v2081_v10, %v4532_v28  ;;  %v2985_v10 = vld [vmem:[%s4972_s23] sm:$0x3] }
 0x5ff   :  { %v4714_v21 = vpop.f32.mrf.mxu1 }
 0x601   :  { %v3890_v22 = vpop.f32.mrf.mxu1 }
 0x61c   :  { %v3923_v32 = vpop.f32.mrf.mxu1 }
 0x61d   :  { %v1658_v33 = vmax.f32 %v3923_v32, %v1655_v30 }
 0x61e   :  { %v1632_v34 = vpop.f32.mrf.mxu1 }
 0x61f   :  { %v1657_v36 = vmax.f32 %v1632_v34, %v1655_v30  ;;  %v1662_v40 = vrot.slane %v1658_v33, 7  ;;  %v1698_v42 = vrot.slane %v1658_v33, 1 }
 0x620   :  { %v3926_v37 = vpop.f32.mrf.mxu1 }
 0x621   :  { %v1661_v41 = vrot.slane %v1657_v36, 7  ;;  %v1697_v59 = vrot.slane %v1657_v36, 1  ;;  %v1660_v63 = vmax.f32 %v3926_v37, %v1655_v30  ;;  %3935 = vmatprep.mubr.msk.f32.mxu0 %vm347_vm2, %v1657_v36  ;;  %v2069_v36 = vrot.slane %v2064_v13, %v4532_v28 }
 0x622   :  { %v1642_v43 = vpop.f32.mrf.mxu1  ;;  %3936 = vmatmul.mubr.msk.f32.vlgmr.msra.gmra.mxu0 %vm347_vm2, %v1658_v33 }
 0x623   :  { %v1667_v44 = vsel %vm439_vm4, %v1661_v41, %v1662_v40  ;;  %v1664_v45 = vrot.slane %v1660_v63, 7  ;;  %v1659_v46 = vmax.f32 %v1642_v43, %v1655_v30  ;;  %3956 = vmatpush3.msra.mxu0 %v3581_v17  ;;  %v1700_v48 = vrot.slane %v1660_v63, 1 }
 0x624   :  { %3957 = vmatprep.subr.mxu0 %v3580_v4  ;;  %v1703_v49 = vsel %vm336_vm3, %v1697_v59, %v1698_v42  ;;  %v1694_v56 = vmul.f32 %v1681_v29, %v1667_v44 }
 0x625   :  { %v1663_v51 = vrot.slane %v1659_v46, 7  ;;  %v1699_v52 = vrot.slane %v1659_v46, 1  ;;  %3938 = vmatprep.mubr.msk.f32.mxu0 %vm347_vm2, %v1659_v46  ;;  %3958 = vmatpush3.msra.mxu0 %v3580_v4  ;;  %v1729_v53 = vmul.f32 %v1712_v31, %v1703_v49  ;;  %v1668_v54 = vsel %vm439_vm4, %v1664_v45, %v1661_v41 }
 0x626   :  { %3939 = vmatmul.mubr.msk.f32.gmra.mxu0 %vm347_vm2, %v1660_v63  ;;  %3959 = vmatprep.subr.mxu0 %v3579_v47  ;;  %v1693_v57 = vmul.f32 %v1676_v25, %v1668_v54  ;;  %v1704_v5 = vsel %vm336_vm3, %v1700_v48, %v1697_v59 }
 0x627   :  { %v1702_v60 = vsel %vm336_vm3, %v1698_v42, %v1699_v52  ;;  %3960 = vmatpush3.msra.mxu0 %v3579_v47  ;;  %3963 = vmatprep.mubr.msk.f32.mxu0 %vm347_vm2, %v1729_v53  ;;  %v1666_v61 = vsel %vm439_vm4, %v1662_v40, %v1663_v51  ;;  %v1701_v62 = vsel %vm336_vm3, %v1699_v52, %v1700_v48 }
 0x628   :  { %v1730_v0 = vmul.f32 %v1717_v35, %v1702_v60  ;;  %3949 = vmatprep.mubr.msk.f32.mxu1 %vm347_vm2, %v1693_v57  ;;  %3961 = vmatprep.subr.mxu0 %v3578_v55  ;;  %v1695_v1 = vmul.f32 %v1686_v39, %v1666_v61  ;;  %v1731_v2 = vmul.f32 %v1722_v58, %v1701_v62 }
 0x629   :  { %3950 = vmatmul.mubr.msk.f32.vlgmr.msra.gmra.mxu1 %vm347_vm2, %v1694_v56  ;;  %3962 = vmatpush3.msra.mxu0 %v3578_v55  ;;  %v1665_v3 = vsel %vm439_vm4, %v1663_v51, %v1664_v45  ;;  %v1732_v8 = vmul.f32 %v1727_v6, %v1704_v5  ;;  %v2095_v6 = vld [vmem:[%s4965_s7 + $0x8] sm:$0xff] }
 0x62a   :  { %3952 = vmatprep.mubr.msk.f32.mxu1 %vm347_vm2, %v1695_v1  ;;  %3964 = vmatmul.mubr.msk.f32.vlgmr.msra.gmra.mxu0 %vm347_vm2, %v1730_v0  ;;  %v1696_v7 = vmul.f32 %v1691_v50, %v1665_v3 }
 0x62b   :  { %3966 = vmatprep.mubr.msk.f32.mxu0 %vm347_vm2, %v1731_v2  ;;  %3980 = vmatprep.subr.mxu0 %v4258_v38 }
 0x62c   :  { %3981 = vmatpush3.msra.mxu0 %v3589_v27  ;;  %v2889_v27 = vld [vmem:[%s4970_s18] sm:$0xff] }
 0x62d   :  { %3953 = vmatmul.mubr.msk.f32.gmra.mxu1 %vm347_vm2, %v1696_v7  ;;  %3982 = vmatprep.subr.mxu0 %v4258_v38  ;;  %v3588_v7 = vld [vmem:[%s4967_s11 + $0x10] sm:$0xff] }
 0x62e   :  { %3967 = vmatmul.mubr.msk.f32.gmra.mxu0 %vm347_vm2, %v1732_v8  ;;  %3977 = vmatprep.mubr.msk.f32.mxu1 %vm347_vm2, %v2094_v11  ;;  %v3594_v8 = vld [vmem:[%s4967_s11 + $0x38] sm:$0xff] }
 0x62f   :  { %3984 = vmatprep.mubr.msk.f32.mxu0 %vm4259_vm5, %v4258_v38  ;;  %3983 = vmatpush3.msra.mxu0 %v3588_v7  ;;  %v2978_v7 = vld [vmem:[%s4971_s22 + $0x20] sm:$0xff] }
 0x630   :  { %3994 = vmatprep.subr.mxu0 %v4258_v38 }
 0x6e2   :  { %v3937_v15 = vpop.f32.mrf.mxu0 }
 0x6e4   :  { %v1820_v16 = vpop.f32.mrf.mxu0 }
 0x6e6   :  { %v3940_v17 = vpop.f32.mrf.mxu0 }
 0x6e8   :  { %v1830_v18 = vpop.f32.mrf.mxu0 }
 0x6e9   :  { %v3951_v19 = vpop.f32.mrf.mxu1 }
 0x6ea   :  { %v1923_v20 = vadd.f32 %v3951_v19, %v3937_v15  ;;  %v3965_v22 = vpop.f32.mrf.mxu0  ;;  %v3604_v19 = vld [vmem:[%s4967_s11 + $0x78] sm:$0xff] }
 0x6eb   :  { %v1917_v24 = vpop.f32.mrf.mxu1 }
 0x6ec   :  { %v2039_v25 = vadd.f32 %v3965_v22, %v1923_v20  ;;  %v1918_v29 = vadd.f32 %v1917_v24, %v1820_v16  ;;  %v2019_v30 = vpop.f32.mrf.mxu0  ;;  %v3598_v22 = vld [vmem:[%s4967_s11 + $0x50] sm:$0xff]  ;;  %v2186_v24 = vld [vmem:[%s4967_s11 + $0x8] sm:$0xff] }
 0x6ed   :  { %v3954_v31 = vpop.f32.mrf.mxu1 }
 0x6ee   :  { %v2050_v32 = vadd.f32 %v2047_v23, %v2039_v25  ;;  %v2038_v33 = vadd.f32 %v2019_v30, %v1918_v29  ;;  %v1933_v34 = vadd.f32 %v3954_v31, %v3940_v17  ;;  %v3968_v35 = vpop.f32.mrf.mxu0  ;;  %v3592_v25 = vld [vmem:[%s4967_s11 + $0x28] sm:$0xff]  ;;  %v3591_v29 = vld [vmem:[%s4967_s11 + $0x20] sm:$0xff] }
 0x6ef   :  { %v1927_v37 = vpop.f32.mrf.mxu1  ;;  %v3597_v31 = vld [vmem:[%s4967_s11 + $0x48] sm:$0xff] }
 0x6f0   :  { %v2061_v39 = vmul.f32 %v2058_v26, %v2050_v32  ;;  %v2049_v40 = vadd.f32 %v2047_v23, %v2038_v33  ;;  %v2041_v41 = vadd.f32 %v3968_v35, %v1933_v34  ;;  %v1928_v59 = vadd.f32 %v1927_v37, %v1830_v18  ;;  %v2029_v63 = vpop.f32.mrf.mxu0  ;;  %v3599_v18 = vld [vmem:[%s4967_s11 + $0x58] sm:$0xff]  ;;  %v3602_v32 = vld [vmem:[%s4967_s11 + $0x68] sm:$0xff]  ;;  %v3596_v33 = vld [vmem:[%s4967_s11 + $0x40] sm:$0xff] }
 0x6f1   :  { %v3601_v34 = vld [vmem:[%s4967_s11 + $0x60] sm:$0xff]  ;;  %v2806_v37 = vld [vmem:[%s4968_s15 + $0x10] sm:$0xff] }
 0x6f2   :  { %v2060_v4 = vmul.f32 %v2058_v26, %v2049_v40  ;;  %v2052_v42 = vadd.f32 %v2047_v23, %v2041_v41  ;;  %v2040_v43 = vadd.f32 %v2029_v63, %v1928_v59  ;;  %v2072_v47 = vadd.f32 %v2069_v36, %v2061_v39  ;;  %v2805_v39 = vld [vmem:[%s4968_s15 + $0x8] sm:$0xff]  ;;  %v2804_v40 = vld [vmem:[%s4968_s15] sm:$0xff] }
 0x6f4   :  { %v2071_v44 = vadd.f32 %v2069_v36, %v2060_v4  ;;  %v2063_v45 = vmul.f32 %v2058_v26, %v2052_v42  ;;  %v2051_v46 = vadd.f32 %v2047_v23, %v2040_v43  ;;  %v2076_v53 = vmax.f32 %v2072_v47, 0.0 }
 0x6f6   :  { %v2075_v48 = vmax.f32 %v2071_v44, 0.0  ;;  %v2062_v49 = vmul.f32 %v2058_v26, %v2051_v46  ;;  %v2074_v50 = vadd.f32 %v2069_v36, %v2063_v45  ;;  %v2083_v60 = vrot.slane %v2076_v53, 1  ;;  %v2185_v26 = vld [vmem:[%s4967_s11] sm:$0xff] }
 0x6f8   :  { %v2078_v51 = vmax.f32 %v2074_v50, 0.0  ;;  %v2073_v52 = vadd.f32 %v2069_v36, %v2062_v49  ;;  %v2082_v54 = vrot.slane %v2075_v48, 1  ;;  %v2807_v36 = vld [vmem:[%s4968_s15 + $0x18] sm:$0xff] }
 0x6fa   :  { %v2085_v55 = vrot.slane %v2078_v51, 1  ;;  %v2077_v56 = vmax.f32 %v2073_v52, 0.0  ;;  %v2088_v2 = vsel %vm336_vm3, %v2082_v54, %v2083_v60 }
 0x6fb   :  { %v2090_v5 = vmax.f32 %v2075_v48, %v2088_v2  ;;  %v2892_v2 = vld [vmem:[%s4970_s18 + $0x18] sm:$0xff] }
 0x6fc   :  { %v2089_v57 = vsel %vm336_vm3, %v2085_v55, %v2082_v54  ;;  %v2084_v58 = vrot.slane %v2077_v56, 1 }
 0x6fd   :  { %v2093_v61 = vmax.f32 %v2078_v51, %v2089_v57 }
 0x6fe   :  { %v2086_v62 = vsel %vm336_vm3, %v2084_v58, %v2085_v55  ;;  %v2087_v0 = vsel %vm336_vm3, %v2083_v60, %v2084_v58 }
 0x6ff   :  { %3969 = vmatprep.subr.mxu1 %v2093_v61  ;;  %v2092_v1 = vmax.f32 %v2077_v56, %v2086_v62  ;;  %v2091_v3 = vmax.f32 %v2076_v53, %v2087_v0 }
 0x700   :  { %3970 = vmatpush3.msra.mxu1 %v2093_v61  ;;  %v3610_v61 = vld [vmem:[%s4969_s16] ss:$0 sm:$0xff] }
 0x701   :  { %3971 = vmatprep.subr.mxu1 %v2092_v1 }
 0x702   :  { %3972 = vmatpush3.msra.mxu1 %v2092_v1 }
 0x703   :  { %3973 = vmatprep.subr.mxu1 %v2091_v3 }
 0x704   :  { %3974 = vmatpush3.msra.mxu1 %v2091_v3  ;;  %v2891_v3 = vld [vmem:[%s4970_s18 + $0x10] sm:$0xff] }
 0x705   :  { %3975 = vmatprep.subr.mxu1 %v2090_v5 }
 0x706   :  { %3976 = vmatpush3.msra.mxu1 %v2090_v5  ;;  %v2979_v5 = vld [vmem:[%s4971_s22 + $0x28] sm:$0xff] }
 0x707   :  { %3978 = vmatmul.mubr.msk.f32.vlgmr.msra.gmra.mxu1 %vm347_vm2, %v2095_v6  ;;  %3987 = vmatprep.subr.mxu1 %v4258_v38  ;;  %v2890_v6 = vld [vmem:[%s4970_s18 + $0x8] sm:$0xff] }
 0x708   :  { %3991 = vmatprep.mubr.msk.f32.mxu1 %vm4259_vm5, %v4258_v38  ;;  %3988 = vmatpush3.msra.mxu1 %v3594_v8  ;;  %v2977_v8 = vld [vmem:[%s4971_s22 + $0x18] sm:$0xff] }
 0x709   :  { %3989 = vmatprep.subr.mxu1 %v4258_v38 }
 0x70a   :  { %3990 = vmatpush3.msra.mxu1 %v3593_v9  ;;  %v2976_v9 = vld [vmem:[%s4971_s22 + $0x10] sm:$0xff] }
 0x70b   :  { %4001 = vmatprep.subr.mxu1 %v4258_v38 }
 0x7c7   :  { %v3979_v11 = vpop.f32.mrf.mxu1 }
 0x7c8   :  { %v2184_v20 = vmax.f32 %v3979_v11, %v2181_v12  ;;  %v3611_v11 = vld [vmem:[%s4973_s26] ss:$0 sm:$0xff] }
 0x7c9   :  { %v2168_v13 = vpop.f32.mrf.mxu1 }
 0x7ca   :  { %v2183_v15 = vmax.f32 %v2168_v13, %v2181_v12  ;;  %v2350_v28 = vrot.slane %v2184_v20, 2  ;;  %v2429_v23 = vrot.slane %v2184_v20, 6  ;;  %v2719_v35 = vrot.slane %v2184_v20, 4 }
 0x7cc   :  { %v2191_v16 = vrot.slane %v2183_v15, 2  ;;  %v2270_v17 = vrot.slane %v2183_v15, 6  ;;  %v2574_v30 = vrot.slane %v2183_v15, 4 }
 0x7ce   :  { %3985 = vmatmul.mubr.msk.f32.vlgmr.msra.gmra.mxu0 %vm772_vm6, %v2191_v16  ;;  %3992 = vmatmul.mubr.msk.f32.vlgmr.msra.gmra.mxu1 %vm772_vm6, %v2270_v17  ;;  %v3551_v16 = vld [vmem:[%s4974_s28] ss:$0 sm:$0xff] }
 0x7cf   :  { %3995 = vmatpush3.msra.mxu0 %v3599_v18  ;;  %4002 = vmatpush3.msra.mxu1 %v3604_v19  ;;  %v1332_v17 = vadd.f32 %v3551_v16, %v4714_v21  ;;  %v2975_v18 = vld [vmem:[%s4971_s22 + $0x8] sm:$0xff]  ;;  %v2980_v21 = vld [vmem:[%s4971_s22 + $0x30] sm:$0xff] }
 0x7d0   :  { %3996 = vmatprep.subr.mxu0 %v4258_v38  ;;  %4003 = vmatprep.subr.mxu1 %v4258_v38 }
 0x7d1   :  { %3997 = vmatpush3.msra.mxu0 %v3598_v22  ;;  %3998 = vmatprep.mubr.msk.f32.mxu0 %vm4259_vm5, %v4258_v38  ;;  %v2984_v22 = vld [vmem:[%s4975_s1] sm:$0x3] }
 0x7d2   :  { %4004 = vmatpush3.msra.mxu1 %v3603_v14  ;;  %4005 = vmatprep.mubr.msk.f32.mxu1 %vm4259_vm5, %v4258_v38  ;;  %v2981_v14 = vld [vmem:[%s4971_s22 + $0x38] sm:$0xff] }
 0x7d3   :  { %3999 = vmatmul.mubr.msk.f32.vlgmr.msra.gmra.mxu0 %vm772_vm6, %v2350_v28  ;;  %4006 = vmatmul.mubr.msk.f32.vlgmr.msra.gmra.mxu1 %vm772_vm6, %v2429_v23 }
 0x7d4   :  { %4008 = vmatprep.subr.mxu0 %v4258_v38  ;;  %4015 = vmatprep.subr.mxu1 %v4258_v38 }
 0x7d5   :  { %4009 = vmatpush3.msra.mxu0 %v2186_v24  ;;  %4016 = vmatpush3.msra.mxu1 %v3592_v25  ;;  %v2983_v25 = vld [vmem:[%s4971_s22 + $0x48] sm:$0xff] }
 0x7d6   :  { %4010 = vmatprep.subr.mxu0 %v4258_v38  ;;  %4017 = vmatprep.subr.mxu1 %v4258_v38 }
 0x7d7   :  { %4011 = vmatpush3.msra.mxu0 %v2185_v26  ;;  %4012 = vmatprep.mubr.msk.f32.mxu0 %vm4259_vm5, %v4258_v38  ;;  %v3293_v26 = vld [vmem:[%s4480_s5 + $0x18] sm:$0xff] }
 0x7d8   :  { %4018 = vmatpush3.msra.mxu1 %v3591_v29  ;;  %4019 = vmatprep.mubr.msk.f32.mxu1 %vm4259_vm5, %v4258_v38  ;;  %v2982_v29 = vld [vmem:[%s4971_s22 + $0x40] sm:$0xff] }
 0x7d9   :  { %4013 = vmatmul.mubr.msk.f32.vlgmr.msra.gmra.mxu0 %vm772_vm6, %v2183_v15  ;;  %4020 = vmatmul.mubr.msk.f32.vlgmr.msra.gmra.mxu1 %vm772_vm6, %v2574_v30  ;;  %v3292_v30 = vld [vmem:[%s4480_s5 + $0x10] sm:$0xff] }
 0x7da   :  { %4022 = vmatprep.subr.mxu0 %v4258_v38  ;;  %4029 = vmatprep.subr.mxu1 %v4258_v38 }
 0x7db   :  { %4023 = vmatpush3.msra.mxu0 %v3597_v31  ;;  %4030 = vmatpush3.msra.mxu1 %v3602_v32  ;;  %v3613_v31 = vld [vmem:[%s4976_s2] ss:$0 sm:$0xff] }
 0x7dc   :  { %4024 = vmatprep.subr.mxu0 %v4258_v38  ;;  %4031 = vmatprep.subr.mxu1 %v4258_v38 }
 0x7dd   :  { %4025 = vmatpush3.msra.mxu0 %v3596_v33  ;;  %4026 = vmatprep.mubr.msk.f32.mxu0 %vm4259_vm5, %v4258_v38 }
 0x7de   :  { %4032 = vmatpush3.msra.mxu1 %v3601_v34  ;;  %4033 = vmatprep.mubr.msk.f32.mxu1 %vm4259_vm5, %v4258_v38 }
 0x7df   :  { %4027 = vmatmul.mubr.msk.f32.vlgmr.msra.gmra.mxu0 %vm772_vm6, %v2184_v20  ;;  %4034 = vmatmul.mubr.msk.f32.vlgmr.msra.gmra.mxu1 %vm772_vm6, %v2719_v35  ;;  %v2974_v20 = vld [vmem:[%s4971_s22] sm:$0xff] }
 0x7e0   :  { %4036 = vmatprep.subr.mxu0 %v4258_v38  ;;  %4044 = vmatprep.mubr.msk.f32.mxu0 %vm4259_vm5, %v4258_v38 }
 0x7e1   :  { %4047 = vmatprep.subr.mxu1 %v4258_v38  ;;  %4055 = vmatprep.mubr.msk.f32.mxu1 %vm4259_vm5, %v4258_v38 }
 0x7e2   :  { %4037 = vmatpush3.msra.mxu0 %v2807_v36  ;;  %4048 = vmatpush3.msra.mxu1 %v2892_v2 }
 0x7e3   :  { %4038 = vmatprep.subr.mxu0 %v4258_v38  ;;  %4049 = vmatprep.subr.mxu1 %v4258_v38 }
 0x7e4   :  { %4039 = vmatpush3.msra.mxu0 %v2806_v37  ;;  %4050 = vmatpush3.msra.mxu1 %v2891_v3 }
 0x7e5   :  { %4040 = vmatprep.subr.mxu0 %v4258_v38  ;;  %4051 = vmatprep.subr.mxu1 %v4258_v38 }
 0x7e6   :  { %4041 = vmatpush3.msra.mxu0 %v2805_v39  ;;  %4052 = vmatpush3.msra.mxu1 %v2890_v6 }
 0x7e7   :  { %4042 = vmatprep.subr.mxu0 %v4258_v38  ;;  %4053 = vmatprep.subr.mxu1 %v4258_v38 }
 0x7e8   :  { %4043 = vmatpush3.msra.mxu0 %v2804_v40  ;;  %4054 = vmatpush3.msra.mxu1 %v2889_v27 }
 0x7e9   :  { %4058 = vmatprep.subr.mxu0 %v4258_v38  ;;  %4069 = vmatprep.subr.mxu1 %v4258_v38 }
 0x88e   :  { %v2260_v41 = vpop.f32.mrf.mxu0  ;;  %v2339_v59 = vpop.f32.mrf.mxu1 }
 0x890   :  { %v3986_v63 = vpop.f32.mrf.mxu0  ;;  %v3993_v4 = vpop.f32.mrf.mxu1 }
 0x891   :  { %v3290_v4 = vld [vmem:[%s4480_s5] sm:$0xff] }
 0x893   :  { %v2419_v42 = vpop.f32.mrf.mxu0  ;;  %v2498_v43 = vpop.f32.mrf.mxu1 }
 0x895   :  { %v4000_v44 = vpop.f32.mrf.mxu0  ;;  %v4007_v45 = vpop.f32.mrf.mxu1 }
 0x896   :  { %v3619_v44 = vld [vmem:[%s4977_s0] ss:$0 sm:$0xff] }
 0x899   :  { %v2570_v46 = vpop.f32.mrf.mxu0  ;;  %v2643_v47 = vpop.f32.mrf.mxu1 }
 0x89a   :  { %v2571_v50 = vadd.f32 %v2570_v46, %v2260_v41  ;;  %v2644_v51 = vadd.f32 %v2643_v47, %v2339_v59  ;;  %v3291_v59 = vld [vmem:[%s4480_s5 + $0x8] sm:$0xff]  ;;  %s4261_s5 = smov [#allocation4]  }
 0x89b   :  { %v4014_v48 = vpop.f32.mrf.mxu0  ;;  %v4021_v49 = vpop.f32.mrf.mxu1  ;;  %s3459_s21 = sshll.u32 %s4261_s5, 4  ;;  %s3460_s21 = int_to_ptr.vmem [resolvable:$true] %s3459_s21 }
 0x89c   :  { %v2792_v58 = vadd.f32 %v2644_v51, %v2571_v50  ;;  %v3622_v50 = vld [vmem:[%s4485_s9] ss:$0 sm:$0xff] }
 0x89f   :  { %v2715_v52 = vpop.f32.mrf.mxu0  ;;  %v2788_v53 = vpop.f32.mrf.mxu1 }
 0x8a0   :  { %v2716_v54 = vadd.f32 %v2715_v52, %v2419_v42  ;;  %v2789_v55 = vadd.f32 %v2788_v53, %v2498_v43 }
 0x8a1   :  { %v4028_v56 = vpop.f32.mrf.mxu0  ;;  %v4035_v57 = vpop.f32.mrf.mxu1 }
 0x8a2   :  { %v2793_v60 = vadd.f32 %v2789_v55, %v2716_v54 }
 0x8a4   :  { %v2794_v62 = vadd.f32 %v2793_v60, %v2792_v58 }
 0x8a6   :  { %v2802_v0 = vadd.f32 %v3610_v61, %v2794_v62 }
 0x8a8   :  { %4160 = vtanh.f32 %v2802_v0 }
 0x8b5   :  { %v4161_v1 = vpop.eup %4160 }
 0x8b6   :  { %4045 = vmatmul.mubr.msk.f32.vlgmr.msra.gmra.mxu0 %vm347_vm2, %v4161_v1 }
 0x8b7   :  { %4066 = vmatprep.mubr.msk.f32.mxu0 %vm4259_vm5, %v4258_v38  ;;  %4059 = vmatpush3.msra.mxu0 %v2979_v5 }
 0x8b8   :  { %4060 = vmatprep.subr.mxu0 %v4258_v38 }
 0x8b9   :  { %4061 = vmatpush3.msra.mxu0 %v2978_v7 }
 0x8ba   :  { %4062 = vmatprep.subr.mxu0 %v4258_v38 }
 0x8bb   :  { %4063 = vmatpush3.msra.mxu0 %v2977_v8 }
 0x8bc   :  { %4064 = vmatprep.subr.mxu0 %v4258_v38 }
 0x8bd   :  { %4065 = vmatpush3.msra.mxu0 %v2976_v9 }
 0x8be   :  { %4067 = vmatmul.mubr.msk.f32.vlgmr.msra.gmra.mxu0 %vm347_vm2, %v2985_v10  ;;  %4083 = vmatprep.subr.mxu0 %v4258_v38 }
 0x8bf   :  { %4087 = vmatprep.mubr.msk.f32.mxu0 %vm4259_vm5, %v4258_v38  ;;  %4084 = vmatpush3.msra.mxu0 %v2983_v25 }
 0x8c0   :  { %4085 = vmatprep.subr.mxu0 %v4258_v38 }
 0x8c1   :  { %4086 = vmatpush3.msra.mxu0 %v2982_v29 }
 0x8c2   :  { %4097 = vmatprep.subr.mxu0 %v4258_v38 }
 0x976   :  { %v2884_v12 = vpop.f32.mrf.mxu0 }
 0x977   :  { %v2885_v13 = vadd.f32 %v3611_v11, %v2884_v12 }
 0x978   :  { %v4046_v15 = vpop.f32.mrf.mxu0 }
 0x979   :  { %4162 = vtanh.f32 %v2885_v13 }
 0x97a   :  { %4164 = vtanh.f32 %v1332_v17 }
 0x97e   :  { %v3055_v23 = vpop.f32.mrf.mxu0 }
 0x980   :  { %v4068_v24 = vpop.f32.mrf.mxu0 }
 0x986   :  { %v4163_v19 = vpop.eup %4162 }
 0x987   :  { %4056 = vmatmul.mubr.msk.f32.vlgmr.msra.gmra.mxu1 %vm347_vm2, %v4163_v19  ;;  %v4165_v28 = vpop.eup %4164 }
 0x988   :  { %4070 = vmatpush3.msra.mxu1 %v2975_v18  ;;  %4073 = vmatprep.mubr.msk.f32.mxu1 %vm4259_vm5, %v4258_v38 }
 0x989   :  { %4071 = vmatprep.subr.mxu1 %v4258_v38 }
 0x98a   :  { %4072 = vmatpush3.msra.mxu1 %v2974_v20 }
 0x98b   :  { %4074 = vmatmul.mubr.msk.f32.vlgmr.msra.gmra.mxu1 %vm772_vm6, %v2984_v22  ;;  %4076 = vmatprep.subr.mxu1 %v4258_v38 }
 0x98c   :  { %4077 = vmatpush3.msra.mxu1 %v2981_v14  ;;  %4080 = vmatprep.mubr.msk.f32.mxu1 %vm4259_vm5, %v4258_v38 }
 0x98d   :  { %4078 = vmatprep.subr.mxu1 %v4258_v38 }
 0x98e   :  { %4079 = vmatpush3.msra.mxu1 %v2980_v21 }
 0x98f   :  { %4081 = vmatmul.mubr.msk.f32.vlgmr.msra.gmra.mxu1 %vm772_vm6, %v4165_v28  ;;  %4090 = vmatprep.subr.mxu1 %v4258_v38 }
 0x990   :  { %4094 = vmatprep.mubr.msk.f32.mxu1 %vm4259_vm5, %v4258_v38  ;;  %4091 = vmatpush3.msra.mxu1 %v3293_v26 }
 0x991   :  { %4092 = vmatprep.subr.mxu1 %v4258_v38 }
 0x992   :  { %4093 = vmatpush3.msra.mxu1 %v3292_v30 }
 0xa47   :  { %v2969_v32 = vpop.f32.mrf.mxu1 }
 0xa48   :  { %v2970_v33 = vadd.f32 %v3613_v31, %v2969_v32 }
 0xa49   :  { %v4057_v34 = vpop.f32.mrf.mxu1 }
 0xa4a   :  { %4166 = vtanh.f32 %v2970_v33 }
 0xa4b   :  { %v3128_v35 = vpop.f32.mrf.mxu1 }
 0xa4c   :  { %v3129_v36 = vadd.f32 %v3128_v35, %v3055_v23 }
 0xa4d   :  { %v4075_v37 = vpop.f32.mrf.mxu1 }
 0xa4f   :  { %v3201_v39 = vpop.f32.mrf.mxu1 }
 0xa50   :  { %v3205_v40 = vadd.f32 %v3201_v39, %v3129_v36 }
 0xa51   :  { %v4082_v41 = vpop.f32.mrf.mxu1 }
 0xa57   :  { %v4167_v63 = vpop.eup %4166 }
 0xa58   :  { %4088 = vmatmul.mubr.msk.f32.vlgmr.msra.gmra.mxu0 %vm772_vm6, %v4167_v63  ;;  %4095 = vmatmul.mubr.msk.f32.vlgmr.msra.gmra.mxu1 %vm772_vm6, %v4167_v63 }
 0xa59   :  { %4098 = vmatpush3.msra.mxu0 %v3291_v59  ;;  %4101 = vmatprep.mubr.msk.f32.mxu0 %vm4259_vm5, %v4258_v38 }
 0xa5a   :  { %4099 = vmatprep.subr.mxu0 %v4258_v38 }
 0xa5b   :  { %4100 = vmatpush3.msra.mxu0 %v3290_v4 }
 0xa5c   :  { %4102 = vmatmul.mubr.msk.f32.vlgmr.msra.gmra.mxu0 %vm772_vm6, %v4165_v28 }
 0xb18   :  { %v3275_v42 = vpop.f32.mrf.mxu0  ;;  %v3360_v43 = vpop.f32.mrf.mxu1 }
 0xb19   :  { %v3279_v45 = vadd.f32 %v3275_v42, %v3205_v40 }
 0xb1a   :  { %v4089_v46 = vpop.f32.mrf.mxu0  ;;  %v4096_v47 = vpop.f32.mrf.mxu1 }
 0xb1b   :  { %v3287_v48 = vadd.f32 %v3619_v44, %v3279_v45 }
 0xb1c   :  { %v3430_v49 = vpop.f32.mrf.mxu0 }
 0xb1d   :  { %v3431_v51 = vadd.f32 %v3430_v49, %v3360_v43  ;;  %3289 = vst.msk [vmem:[#allocation2] sm:$0x3] %vm3288_vm8, %v3287_v48 }
 0xb1e   :  { %v4103_v38 = vpop.f32.mrf.mxu0 }
 0xb1f   :  { %4179 = shalt.err (!%p4176_p4)
}
 0xb20   :  { %3452 = dma.vmem_to_hbm [thread:$0]  %s3450_s17, 32, %s4490_s27, [#allocation3]   ;;  %v3441_v52 = vadd.f32 %v3622_v50, %v3431_v51 }
 0xb21   :  { %s4188_s9 = scalar_lea.vmem %s3460_s21, 32  ;;  %p4193_p6 = scmp.lt.s32.totalorder %s3460_s21, %s3460_s21 }
 0xb22   :  { %3442 = vst.msk [vmem:[#allocation4] sm:$0x3] %vm3288_vm8, %v3441_v52  ;;  %p4189_p5 = scmp.ne.s32.totalorder %s3460_s21, %s4188_s9  ;;  %p4194_p7 = scmp.lt.s32.totalorder %s4188_s9, %s4188_s9 }
 0xb24   :  { %p4195_p8 = por %p4194_p7, %p4193_p6 }
 0xb26   :  { %p4196_p9 = pnand %p4195_p8, %p4189_p5 }
 0xb28   :  { %4199 = shalt.err (!%p4196_p9)
}
 0xb29   :  { %3462 = dma.vmem_to_hbm [thread:$0]  %s3460_s21, 32, %s4495_s6, [#allocation5]  }
 0xb2a   :  { %4208 = dma.done.wait [#allocation3], 32  }
 0xb2b   :  { %4209 = vsyncadd [#allocation3], 4294967264 }
 0xb2c   :  { %4210 = dma.done.wait [#allocation5], 32  }
 0xb2d   :  { %4211 = vsyncadd [#allocation5], 4294967264 }
 0xb2e   :  { %3469 = vsyncpa [#allocation3], 1 }
 0xb2f   :  { %3470 = vsyncpa [#allocation5], 1 }

</bundles_post_ra>
